<compile_context>
chip_gen: v7x
topology: tpu7x:2x2x1
jax: 0.10.0
libtpu: 0.0.40
codegen_flags: <defaults>
</compile_context>

<pallas_src>
import functools

import numpy as np

import jax
import jax.numpy as jnp
from jax.experimental import pallas as pl
from jax.experimental.pallas import tpu as pltpu


def _nn_energy_kernel(base_ref,                       # SMEM (grid_steps,) int32: window block start per tile
                      x_ref, sid_ref, w1_ref, b1_ref, w2_ref, b2_ref, w3_ref,
                      e_ref, *, win_blocks):
    t = pl.program_id(1)  # inner (reduction) axis over atom tiles

    # Output block is resident across the inner axis -> it is the accumulator.
    @pl.when(t == 0)
    def _():
        e_ref[...] = jnp.zeros_like(e_ref)

    # Per-atom MLP.  MXU operands in the weights' dtype (bf16 by default), f32 accumulate,
    # f32 tanh (v5e has no bf16 VPU/EUP).
    x = x_ref[...].astype(w1_ref.dtype)                               # (TM, D)
    h1 = jnp.tanh(
        jnp.dot(x, w1_ref[...], preferred_element_type=jnp.float32) + b1_ref[...])
    h2 = jnp.tanh(
        jnp.dot(h1.astype(w2_ref.dtype), w2_ref[...],
                preferred_element_type=jnp.float32) + b2_ref[...])

    # Final Linear(L, 1): VPU multiply + lane reduce (no lane-1 MXU pass).  b3 is folded
    # into the wrapper (counts * b3), so padded / garbage rows need no bias handling.
    per_atom = jnp.sum(h2 * w3_ref[...], axis=-1, keepdims=True)      # (TM, 1) f32

    # Windowed segment sum: only the [base*128, base*128 + win) structure range can be
    # touched by this tile (wrapper guarantees it).  Sentinel sid = -1 never matches.
    flat_tile = pl.program_id(0) * pl.num_programs(1) + t
    base_blk = base_ref[flat_tile]                                    # int32 scalar (SMEM)
    sids = sid_ref[...]                                               # (TM, 1) int32
    win = win_blocks * 128
    win_ids = (jax.lax.broadcasted_iota(jnp.int32, (1, win), 1)
               + base_blk * 128)                                      # (1, win)
    scattered = jnp.where(sids == win_ids, per_atom, 0.0)             # (TM, win) f32
    contrib = jnp.sum(scattered, axis=0, keepdims=True)               # (1, win) f32

    # Accumulate each 128-wide chunk into its structure block (dynamic leading-dim index).
    for j in range(win_blocks):
        e_ref[base_blk + j] += contrib[:, j * 128:(j + 1) * 128]


def nn_model_energies(x, structure_map, params, n_structures, *,
                      tile_m=512, num_cores=1, mxu_dtype=jnp.bfloat16):
    """x: (n_atoms, D) f32, structure_map: (n_atoms,) int32 -> energies (n_structures, 1) f32."""
    assert tile_m % 8 == 0
    x = jnp.asarray(x)
    n_atoms, d = x.shape
    w1, b1, w2, b2, w3, b3 = params
    layer = w1.shape[1]

    l_pad = ((layer + 127) // 128) * 128
    s_pad = ((max(n_structures, 1) + 127) // 128) * 128
    nb = s_pad // 128

    # Zero-pad hidden width to a lane multiple; padded columns give tanh(0 + 0) = 0, so
    # they contribute nothing.  Weights are tiny -> one-time cast/pad is cheap.
    w1p = jnp.pad(jnp.asarray(w1, jnp.float32), ((0, 0), (0, l_pad - layer))).astype(mxu_dtype)
    b1p = jnp.pad(jnp.asarray(b1, jnp.float32).reshape(1, layer), ((0, 0), (0, l_pad - layer)))
    w2p = jnp.pad(jnp.asarray(w2, jnp.float32),
                  ((0, l_pad - layer), (0, l_pad - layer))).astype(mxu_dtype)
    b2p = jnp.pad(jnp.asarray(b2, jnp.float32).reshape(1, layer), ((0, 0), (0, l_pad - layer)))
    w3p = jnp.pad(jnp.asarray(w3, jnp.float32).reshape(1, layer), ((0, 0), (0, l_pad - layer)))

    total_tiles = max(1, -(-n_atoms // tile_m))
    tiles_per_core = -(-total_tiles // num_cores)
    grid_steps = num_cores * tiles_per_core

    # Pad only the structure ids (4 B/atom) so every sid block is valid; x stays unpadded.
    sid_pad_len = grid_steps * tile_m
    sid = structure_map.astype(jnp.int32)
    sid2d = jnp.pad(sid, (0, sid_pad_len - n_atoms), constant_values=-1).reshape(sid_pad_len, 1)

    # Host-side window sizing (needs concrete structure_map): per tile, the 128-aligned
    # block of the minimum valid sid, plus a static window wide enough for every tile.
    sid_np = np.full((sid_pad_len,), -1, np.int32)
    sid_np[:n_atoms] = np.asarray(structure_map, dtype=np.int32)
    tiles_np = sid_np.reshape(grid_steps, tile_m)
    valid = tiles_np >= 0
    lo = np.where(valid, tiles_np, np.iinfo(np.int32).max).min(axis=1)
    hi = np.where(valid, tiles_np, -1).max(axis=1)
    has_valid = valid.any(axis=1)
    lo = np.where(has_valid, lo, 0)
    hi = np.where(has_valid, hi, 0)
    base_blk = (lo // 128).astype(np.int64)
    win_blocks = int(np.max(hi // 128 - base_blk + 1))
    win_blocks = max(1, min(win_blocks, nb))
    base_blk = jnp.asarray(np.minimum(base_blk, nb - win_blocks).astype(np.int32))

    # b3 folded out of the kernel: add counts_per_structure * b3 in the wrapper.
    counts = np.bincount(np.asarray(structure_map, dtype=np.int64).clip(0),
                         minlength=n_structures)[:n_structures]
    counts = jnp.asarray(counts, jnp.float32).reshape(n_structures, 1)

    # Index maps (scalar-prefetch ref arrives as a trailing positional arg).
    def x_map(c, t, base):
        # Clamp fully out-of-range tiles (num_cores padding) to the last real block;
        # their sid block is all -1 so they contribute nothing.
        return (jnp.minimum(c * tiles_per_core + t, total_tiles - 1), 0)

    def sid_map(c, t, base):
        return (c * tiles_per_core + t, 0)

    def const2(c, t, base):
        return (0, 0)

    # VMEM budget: double-buffered x/sid tiles + resident weights + output block + the
    # windowed scatter intermediate + elementwise scratch, with headroom; capped at
    # 48 MiB (v7x-safe; v5e/v6e's 128 MiB VMEM would allow more).
    mxu_bytes = jnp.dtype(mxu_dtype).itemsize
    est = (2 * tile_m * d * x.dtype.itemsize
           + 2 * tile_m * 128 * 4
           + 2 * ((d + l_pad) * l_pad * mxu_bytes + 3 * l_pad * 4)
           + 2 * nb * 8 * 128 * 4
           + tile_m * win_blocks * 128 * 4
           + 4 * tile_m * l_pad * 4)
    vmem_limit = int(min(max(2 * est, 32 * 1024 * 1024), 48 * 1024 * 1024))

    kernel = functools.partial(_nn_energy_kernel, win_blocks=win_blocks)

    out = pl.pallas_call(
        kernel,
        out_shape=jax.ShapeDtypeStruct((num_cores, nb, 1, 128), jnp.float32),
        grid_spec=pltpu.PrefetchScalarGridSpec(
            num_scalar_prefetch=1,
            grid=(num_cores, tiles_per_core),
            in_specs=[
                pl.BlockSpec((tile_m, d), x_map),        # x tile (streamed, possibly partial tail)
                pl.BlockSpec((tile_m, 1), sid_map),      # structure ids tile (padded w/ -1)
                pl.BlockSpec((d, l_pad), const2),        # w1 (resident)
                pl.BlockSpec((1, l_pad), const2),        # b1
                pl.BlockSpec((l_pad, l_pad), const2),    # w2
                pl.BlockSpec((1, l_pad), const2),        # b2
                pl.BlockSpec((1, l_pad), const2),        # w3 as a row
            ],
            out_specs=pl.BlockSpec((None, nb, 1, 128), lambda c, t, base: (c, 0, 0, 0)),
        ),
        compiler_params=pltpu.CompilerParams(
            dimension_semantics=("parallel", "arbitrary"),
            vmem_limit_bytes=vmem_limit),
    )(base_blk, x, sid2d, w1p, b1p, w2p, b2p, w3p)

    # Sum per-core partials, drop structure padding, add the folded-out bias.
    e_row = out.sum(axis=0).reshape(s_pad)[:n_structures].reshape(n_structures, 1)
    return e_row + counts * jnp.asarray(b3, jnp.float32).reshape(1, 1)


def init_params(key, d, layer_size):
    """torch.nn.Linear default init: U(-1/sqrt(fan_in), 1/sqrt(fan_in))."""
    ks = jax.random.split(key, 6)

    def lin(kw, kb, fan_in, fan_out):
        bound = 1.0 / jnp.sqrt(fan_in)
        w = jax.random.uniform(kw, (fan_in, fan_out), jnp.float32, -bound, bound)
        b = jax.random.uniform(kb, (fan_out,), jnp.float32, -bound, bound)
        return w, b

    w1, b1 = lin(ks[0], ks[1], d, layer_size)
    w2, b2 = lin(ks[2], ks[3], layer_size, layer_size)
    w3, b3 = lin(ks[4], ks[5], layer_size, 1)
    return (w1, b1, w2, b2, w3, b3)


def reference_energies(x, structure_map, params, n_structures):
    w1, b1, w2, b2, w3, b3 = params
    h = jnp.tanh(x @ w1 + b1)
    h = jnp.tanh(h @ w2 + b2)
    per_atom = h @ w3 + b3                                   # (n_atoms, 1)
    e = jnp.zeros((n_structures, 1), jnp.float32)
    return e.at[structure_map].add(per_atom)


if __name__ == "__main__":
    key = jax.random.PRNGKey(0)
    k1, k2, k3, k4, k5, k6, k7 = jax.random.split(key, 7)

    # ---- Case 1: multi-tile, partial trailing tile, n_structures > 128 -----------------
    n_atoms, d, layer_size, n_struct = 900, 96, 100, 300
    x = jax.random.normal(k1, (n_atoms, d), jnp.float32)
    sid_sorted = jnp.sort(jax.random.randint(k2, (n_atoms,), 0, n_struct)).astype(jnp.int32)
    params = init_params(k3, d, layer_size)
    ref = reference_energies(x, sid_sorted, params, n_struct)

    # f32 MXU path: exact module semantics (tight tolerance); exercises windowed scatter
    # with nonzero dynamic base blocks and t>0 accumulation.
    e_f32 = nn_model_energies(x, sid_sorted, params, n_struct,
                              tile_m=256, mxu_dtype=jnp.float32)
    e_f32 = jax.block_until_ready(e_f32)
    assert e_f32.shape == (n_struct, 1)
    assert jnp.allclose(e_f32, ref, rtol=1e-4, atol=1e-4), float(jnp.max(jnp.abs(e_f32 - ref)))

    # Default bf16-MXU path (tile_m=512), looser tolerance vs the f32 reference.
    e_bf16 = nn_model_energies(x, sid_sorted, params, n_struct)
    e_bf16 = jax.block_until_ready(e_bf16)
    assert jnp.allclose(e_bf16, ref, rtol=5e-2, atol=1e-1), float(jnp.max(jnp.abs(e_bf16 - ref)))

    # ---- Case 2: unsorted structure_map -> window falls back to the full width ---------
    sid_shuf = jax.random.permutation(k4, sid_sorted)
    ref_u = reference_energies(x, sid_shuf, params, n_struct)
    e_u = nn_model_energies(x, sid_shuf, params, n_struct,
                            tile_m=256, mxu_dtype=jnp.float32)
    e_u = jax.block_until_ready(e_u)
    assert jnp.allclose(e_u, ref_u, rtol=1e-4, atol=1e-4), float(jnp.max(jnp.abs(e_u - ref_u)))

    # ---- Case 3: tiny shapes + num_cores=2 (padded/clamped out-of-range tile) ----------
    n_atoms3, d3, layer3, ns3 = 300, 32, 32, 3
    x3 = jax.random.normal(k5, (n_atoms3, d3), jnp.float32)
    sid3 = jnp.repeat(jnp.arange(ns3, dtype=jnp.int32), n_atoms3 // ns3)
    params3 = init_params(k6, d3, layer3)
    ref3 = reference_energies(x3, sid3, params3, ns3)
    e3 = nn_model_energies(x3, sid3, params3, ns3,
                           tile_m=128, num_cores=2, mxu_dtype=jnp.float32)
    e3 = jax.block_until_ready(e3)
    assert e3.shape == (ns3, 1)
    assert jnp.allclose(e3, ref3, rtol=1e-4, atol=1e-4), float(jnp.max(jnp.abs(e3 - ref3)))

    print("KERNEL_OK")
</pallas_src>

<mosaic_0001>
module attributes {stable_mosaic.version = 11 : i64} {
  func.func @_nn_energy_kernel(%arg0: i32, %arg1: i32, %arg2: memref<4xi32, #tpu.memory_space<smem>>, %arg3: memref<256x96xf32, #tpu.memory_space<vmem>>, %arg4: memref<256x1xi32, #tpu.memory_space<vmem>>, %arg5: memref<96x128xf32, #tpu.memory_space<vmem>>, %arg6: memref<1x128xf32, #tpu.memory_space<vmem>>, %arg7: memref<128x128xf32, #tpu.memory_space<vmem>>, %arg8: memref<1x128xf32, #tpu.memory_space<vmem>>, %arg9: memref<1x128xf32, #tpu.memory_space<vmem>>, %arg10: memref<1x3x1x128xf32, #tpu.memory_space<vmem>>) attributes {dimension_semantics = [#tpu.dimension_semantics<parallel>, #tpu.dimension_semantics<arbitrary>], iteration_bounds = array<i64: 1, 4>, scalar_prefetch = 1 : i64, scratch_operands = 0 : i64, tpu.core_type = #tpu.core_type<tc>, window_params = [{transform_indices = @transform_0, window_bounds = array<i64: 256, 96>}, {transform_indices = @transform_1, window_bounds = array<i64: 256, 1>}, {pipeline_mode = #tpu.pipeline_mode<synchronous>, transform_indices = @transform_2, window_bounds = array<i64: 96, 128>}, {pipeline_mode = #tpu.pipeline_mode<synchronous>, transform_indices = @transform_3, window_bounds = array<i64: 1, 128>}, {pipeline_mode = #tpu.pipeline_mode<synchronous>, transform_indices = @transform_4, window_bounds = array<i64: 128, 128>}, {pipeline_mode = #tpu.pipeline_mode<synchronous>, transform_indices = @transform_5, window_bounds = array<i64: 1, 128>}, {pipeline_mode = #tpu.pipeline_mode<synchronous>, transform_indices = @transform_6, window_bounds = array<i64: 1, 128>}, {transform_indices = @transform_7, window_bounds = array<i64: 1, 3, 1, 128>}]} {
    %c0_i32 = arith.constant 0 : i32
    %0 = arith.cmpi eq, %arg1, %c0_i32 : i32
    %1 = arith.extui %0 : i1 to i32
    %c0_i32_0 = arith.constant 0 : i32
    %2 = arith.cmpi ne, %1, %c0_i32_0 : i32
    scf.if %2 {
      %cst_31 = arith.constant 0.000000e+00 : f32
      %59 = vector.broadcast %cst_31 : f32 to vector<3x1x128xf32>
      %c0_32 = arith.constant 0 : index
      %c0_33 = arith.constant 0 : index
      %c0_34 = arith.constant 0 : index
      %c0_35 = arith.constant 0 : index
      %60 = vector.load %arg10[%c0_32, %c0_33, %c0_34, %c0_35] : memref<1x3x1x128xf32, #tpu.memory_space<vmem>>, vector<1x3x1x128xf32>
      %61 = vector.shape_cast %60 : vector<1x3x1x128xf32> to vector<3x1x128xf32>
      %62 = vector.shape_cast %59 : vector<3x1x128xf32> to vector<1x3x1x128xf32>
      tpu.vector_store %arg10[%c0_32, %c0_33, %c0_34, %c0_35], %62 {strides = array<i32>} : memref<1x3x1x128xf32, #tpu.memory_space<vmem>>, vector<1x3x1x128xf32>,
    } else {
    }
    %c0 = arith.constant 0 : index
    %c0_1 = arith.constant 0 : index
    %3 = vector.load %arg3[%c0, %c0_1] : memref<256x96xf32, #tpu.memory_space<vmem>>, vector<256x96xf32>
    %c0_2 = arith.constant 0 : index
    %c0_3 = arith.constant 0 : index
    %4 = vector.load %arg5[%c0_2, %c0_3] : memref<96x128xf32, #tpu.memory_space<vmem>>, vector<96x128xf32>
    %cst = arith.constant dense<0.000000e+00> : vector<256x128xf32>
    %5 = tpu.matmul %3, %4, %cst {dimension_numbers = #tpu.dot_dimension_numbers<[1], [0], [0], [1], [0, 0, 1, 1], [], []>} : vector<256x96xf32>, vector<96x128xf32>, vector<256x128xf32> -> vector<256x128xf32>
    %c0_4 = arith.constant 0 : index
    %c0_5 = arith.constant 0 : index
    %6 = vector.load %arg6[%c0_4, %c0_5] : memref<1x128xf32, #tpu.memory_space<vmem>>, vector<1x128xf32>
    %7 = vector.broadcast %6 : vector<1x128xf32> to vector<256x128xf32>
    %8 = arith.addf %5, %7 : vector<256x128xf32>
    %9 = math.tanh %8 : vector<256x128xf32>
    %c0_6 = arith.constant 0 : index
    %c0_7 = arith.constant 0 : index
    %10 = vector.load %arg7[%c0_6, %c0_7] : memref<128x128xf32, #tpu.memory_space<vmem>>, vector<128x128xf32>
    %cst_8 = arith.constant dense<0.000000e+00> : vector<256x128xf32>
    %11 = tpu.matmul %9, %10, %cst_8 {dimension_numbers = #tpu.dot_dimension_numbers<[1], [0], [0], [1], [0, 0, 1, 1], [], []>} : vector<256x128xf32>, vector<128x128xf32>, vector<256x128xf32> -> vector<256x128xf32>
    %c0_9 = arith.constant 0 : index
    %c0_10 = arith.constant 0 : index
    %12 = vector.load %arg8[%c0_9, %c0_10] : memref<1x128xf32, #tpu.memory_space<vmem>>, vector<1x128xf32>
    %13 = vector.broadcast %12 : vector<1x128xf32> to vector<256x128xf32>
    %14 = arith.addf %11, %13 : vector<256x128xf32>
    %15 = math.tanh %14 : vector<256x128xf32>
    %c0_11 = arith.constant 0 : index
    %c0_12 = arith.constant 0 : index
    %16 = vector.load %arg9[%c0_11, %c0_12] : memref<1x128xf32, #tpu.memory_space<vmem>>, vector<1x128xf32>
    %17 = vector.broadcast %16 : vector<1x128xf32> to vector<256x128xf32>
    %18 = arith.mulf %15, %17 : vector<256x128xf32>
    %cst_13 = arith.constant dense<0.000000e+00> : vector<256xf32>
    %19 = vector.multi_reduction <add>, %18, %cst_13 [1] : vector<256x128xf32> to vector<256xf32>
    %20 = vector.shape_cast %19 : vector<256xf32> to vector<256x1xf32>
    %c4_i32 = arith.constant 4 : i32
    %21 = arith.muli %arg0, %c4_i32 : i32
    %22 = arith.addi %21, %arg1 : i32
    %23 = arith.index_cast %22 : i32 to index
    %24 = memref.load %arg2[%23] : memref<4xi32, #tpu.memory_space<smem>>
    %c0_14 = arith.constant 0 : index
    %c0_15 = arith.constant 0 : index
    %25 = vector.load %arg4[%c0_14, %c0_15] : memref<256x1xi32, #tpu.memory_space<vmem>>, vector<256x1xi32>
    %26 = tpu.iota {dimensions = array<i32: 1>} : vector<1x256xi32>
    %c128_i32 = arith.constant 128 : i32
    %27 = arith.muli %24, %c128_i32 : i32
    %28 = vector.broadcast %27 : i32 to vector<1x256xi32>
    %29 = arith.addi %26, %28 : vector<1x256xi32>
    %30 = vector.broadcast %25 : vector<256x1xi32> to vector<256x256xi32>
    %31 = vector.broadcast %29 : vector<1x256xi32> to vector<256x256xi32>
    %32 = arith.cmpi eq, %30, %31 : vector<256x256xi32>
    %cst_16 = arith.constant 0.000000e+00 : f32
    %33 = vector.shape_cast %20 : vector<256x1xf32> to vector<256x1xf32>
    %34 = vector.broadcast %33 : vector<256x1xf32> to vector<256x256xf32>
    %35 = vector.broadcast %cst_16 : f32 to vector<256x256xf32>
    %36 = arith.select %32, %34, %35 : vector<256x256xi1>, vector<256x256xf32>
    %cst_17 = arith.constant dense<0.000000e+00> : vector<256xf32>
    %37 = vector.multi_reduction <add>, %36, %cst_17 [0] : vector<256x256xf32> to vector<256xf32>
    %38 = vector.shape_cast %37 : vector<256xf32> to vector<1x256xf32>
    %c0_i32_18 = arith.constant 0 : i32
    %39 = arith.addi %24, %c0_i32_18 : i32
    %c0_19 = arith.constant 0 : index
    %40 = arith.index_cast %39 : i32 to index
    %c0_20 = arith.constant 0 : index
    %c0_21 = arith.constant 0 : index
    %41 = vector.load %arg10[%c0_19, %40, %c0_20, %c0_21] : memref<1x3x1x128xf32, #tpu.memory_space<vmem>>, vector<1x1x1x128xf32>
    %42 = vector.shape_cast %41 : vector<1x1x1x128xf32> to vector<1x128xf32>
    %43 = vector.extract_strided_slice %38 {offsets = [0, 0], sizes = [1, 128], strides = [1, 1]} : vector<1x256xf32> to vector<1x128xf32>
    %44 = arith.addf %42, %43 : vector<1x128xf32>
    %c0_22 = arith.constant 0 : index
    %45 = arith.index_cast %39 : i32 to index
    %c0_23 = arith.constant 0 : index
    %c0_24 = arith.constant 0 : index
    %46 = vector.load %arg10[%c0_22, %45, %c0_23, %c0_24] : memref<1x3x1x128xf32, #tpu.memory_space<vmem>>, vector<1x1x1x128xf32>
    %47 = vector.shape_cast %46 : vector<1x1x1x128xf32> to vector<1x128xf32>
    %48 = vector.shape_cast %44 : vector<1x128xf32> to vector<1x1x1x128xf32>
    tpu.vector_store %arg10[%c0_22, %45, %c0_23, %c0_24], %48 {strides = array<i32>} : memref<1x3x1x128xf32, #tpu.memory_space<vmem>>, vector<1x1x1x128xf32>,
    %c1_i32 = arith.constant 1 : i32
    %49 = arith.addi %24, %c1_i32 : i32
    %c0_25 = arith.constant 0 : index
    %50 = arith.index_cast %49 : i32 to index
    %c0_26 = arith.constant 0 : index
    %c0_27 = arith.constant 0 : index
    %51 = vector.load %arg10[%c0_25, %50, %c0_26, %c0_27] : memref<1x3x1x128xf32, #tpu.memory_space<vmem>>, vector<1x1x1x128xf32>
    %52 = vector.shape_cast %51 : vector<1x1x1x128xf32> to vector<1x128xf32>
    %53 = vector.extract_strided_slice %38 {offsets = [0, 128], sizes = [1, 128], strides = [1, 1]} : vector<1x256xf32> to vector<1x128xf32>
    %54 = arith.addf %52, %53 : vector<1x128xf32>
    %c0_28 = arith.constant 0 : index
    %55 = arith.index_cast %49 : i32 to index
    %c0_29 = arith.constant 0 : index
    %c0_30 = arith.constant 0 : index
    %56 = vector.load %arg10[%c0_28, %55, %c0_29, %c0_30] : memref<1x3x1x128xf32, #tpu.memory_space<vmem>>, vector<1x1x1x128xf32>
    %57 = vector.shape_cast %56 : vector<1x1x1x128xf32> to vector<1x128xf32>
    %58 = vector.shape_cast %54 : vector<1x128xf32> to vector<1x1x1x128xf32>
    tpu.vector_store %arg10[%c0_28, %55, %c0_29, %c0_30], %58 {strides = array<i32>} : memref<1x3x1x128xf32, #tpu.memory_space<vmem>>, vector<1x1x1x128xf32>,
    return
  }
  func.func @transform_0(%arg0: i32, %arg1: i32, %arg2: memref<4xi32, #tpu.memory_space<smem>>) -> (i32, i32) {
    %c4_i32 = arith.constant 4 : i32
    %0 = arith.muli %arg0, %c4_i32 : i32
    %1 = arith.addi %0, %arg1 : i32
    %c3_i32 = arith.constant 3 : i32
    %2 = arith.minsi %1, %c3_i32 : i32
    %c0_i32 = arith.constant 0 : i32
    %c0_i32_0 = arith.constant 0 : i32
    return %2, %c0_i32 : i32, i32
  }
  func.func @transform_1(%arg0: i32, %arg1: i32, %arg2: memref<4xi32, #tpu.memory_space<smem>>) -> (i32, i32) {
    %c4_i32 = arith.constant 4 : i32
    %0 = arith.muli %arg0, %c4_i32 : i32
    %1 = arith.addi %0, %arg1 : i32
    %c0_i32 = arith.constant 0 : i32
    %c0_i32_0 = arith.constant 0 : i32
    return %1, %c0_i32 : i32, i32
  }
  func.func @transform_2(%arg0: i32, %arg1: i32, %arg2: memref<4xi32, #tpu.memory_space<smem>>) -> (i32, i32) {
    %c0_i32 = arith.constant 0 : i32
    %c0_i32_0 = arith.constant 0 : i32
    %c0_i32_1 = arith.constant 0 : i32
    return %c0_i32, %c0_i32_0 : i32, i32
  }
  func.func @transform_3(%arg0: i32, %arg1: i32, %arg2: memref<4xi32, #tpu.memory_space<smem>>) -> (i32, i32) {
    %c0_i32 = arith.constant 0 : i32
    %c0_i32_0 = arith.constant 0 : i32
    %c0_i32_1 = arith.constant 0 : i32
    return %c0_i32, %c0_i32_0 : i32, i32
  }
  func.func @transform_4(%arg0: i32, %arg1: i32, %arg2: memref<4xi32, #tpu.memory_space<smem>>) -> (i32, i32) {
    %c0_i32 = arith.constant 0 : i32
    %c0_i32_0 = arith.constant 0 : i32
    %c0_i32_1 = arith.constant 0 : i32
    return %c0_i32, %c0_i32_0 : i32, i32
  }
  func.func @transform_5(%arg0: i32, %arg1: i32, %arg2: memref<4xi32, #tpu.memory_space<smem>>) -> (i32, i32) {
    %c0_i32 = arith.constant 0 : i32
    %c0_i32_0 = arith.constant 0 : i32
    %c0_i32_1 = arith.constant 0 : i32
    return %c0_i32, %c0_i32_0 : i32, i32
  }
  func.func @transform_6(%arg0: i32, %arg1: i32, %arg2: memref<4xi32, #tpu.memory_space<smem>>) -> (i32, i32) {
    %c0_i32 = arith.constant 0 : i32
    %c0_i32_0 = arith.constant 0 : i32
    %c0_i32_1 = arith.constant 0 : i32
    return %c0_i32, %c0_i32_0 : i32, i32
  }
  func.func @transform_7(%arg0: i32, %arg1: i32, %arg2: memref<4xi32, #tpu.memory_space<smem>>) -> (i32, i32, i32, i32) {
    %c0_i32 = arith.constant 0 : i32
    %c0_i32_0 = arith.constant 0 : i32
    %c0_i32_1 = arith.constant 0 : i32
    %c0_i32_2 = arith.constant 0 : i32
    return %arg0, %c0_i32, %c0_i32_0, %c0_i32_1 : i32, i32, i32, i32
  }
}

</mosaic_0001>

<bundles_post_ra>
// kernel: tpu_custom_call.1
= control target key start
LH: loop header
LB: loop body
LE: loop exit
PB: predicated region body
PF: predicated region fallthrough
CT: control target
= control target key end

     0   :  { %s2803_s0 = inlined_call_operand.vmem [shape: s32[4], index: 0, kind: input, shape index: {}]   ;;  %s2804_s1 = inlined_call_operand.vmem [shape: f32[900,96], index: 1, kind: input, shape index: {}]   ;;  %s2805_s2 = inlined_call_operand.vmem [shape: s32[1024,1], index: 2, kind: input, shape index: {}]   ;;  %s2806_s3 = inlined_call_operand.vmem [shape: f32[96,128], index: 3, kind: input, shape index: {}]   ;;  %s2807_s4 = inlined_call_operand.vmem [shape: f32[1,128], index: 4, kind: input, shape index: {}]   ;;  %s2808_s5 = inlined_call_operand.vmem [shape: f32[128,128], index: 5, kind: input, shape index: {}]   ;;  %s2809_s6 = inlined_call_operand.vmem [shape: f32[1,128], index: 6, kind: input, shape index: {}]   ;;  %s2810_s7 = inlined_call_operand.vmem [shape: f32[1,128], index: 7, kind: input, shape index: {}]   ;;  %s2811_s8 = inlined_call_operand.hbm [shape: f32[1,3,1,128], index: 8, kind: output, shape index: {}]  }
   0x1   :  { %s13_s29 = sshll.u32 %s2803_s0, 4  ;;  %s14_s29 = int_to_ptr.vmem [resolvable:$true] %s13_s29 }
   0x2   :  { %s2129_s30 = scalar_lea.vmem %s14_s29, 16  ;;  %p2134_p1 = scmp.lt.s32.totalorder %s14_s29, %s14_s29 }
   0x3   :  { %p2130_p0 = scmp.ne.s32.totalorder %s14_s29, %s2129_s30  ;;  %p2135_p2 = scmp.lt.s32.totalorder %s2129_s30, %s2129_s30 }
   0x5   :  { %p2136_p3 = por %p2135_p2, %p2134_p1 }
   0x7   :  { %p2137_p4 = pnand %p2136_p3, %p2130_p0 }
   0x9   :  { %2140 = shalt.err (!%p2137_p4)  }
   0xa   :  { %s2197_s9 = smov [#allocation3]  }
   0xb   :  { %16 = dma.vmem_to_smem %s14_s29, 16, %s2197_s9, [#allocation2] }
   0xc   :  { %2179 = dma.done.wait [#allocation2], 16 }
   0xd   :  { %2180 = vsyncadd [#allocation2], 4294967280 }
   0xe   :  { %18 = sfence }
   0xf   :  { %19 = vsyncpa [#allocation5], 0  ;;  %s2251_s10 = smov 0   ;;  %s2253_s11 = smov 0  }
  0x10   :  { %s2255_s12 = smov 0  }
  0x11 LB: > { %s1596_s0 = sadd.s32 4294967295, %s2195_s12   ;;  %s34_s13 = sadd.s32 1, %s2191_s11  ;;  %s2195_s12 = sphi %s2255_s12, %s25_s12   ;;  %s2191_s11 = sphi %s2253_s11, %s2814_s11   ;;  %s2187_s10 = sphi %s2251_s10, %s2813_s10  }
  0x12   : > { %p35_p5 = scmp.ge.s32.totalorder %s34_s13, 4  ;;  %p1599_p6 = scmp.ge.s32.totalorder %s2195_s12, 1 }
  0x13   : > { %p301_p7 = scmp.lt.s32.totalorder %s2195_s12, 5 }
  0x14   : > { %s2816_s13 = smov (%p35_p5, %s34_s13), 0 }
  0x15   : > { %p302_p8 = pnand %p1599_p6, %p301_p7 }
  0x16   : > { %p345_p9 = scmp.lt.s32.totalorder (!%p302_p8), %s2187_s10, 3  ;;  %s1602_s14 = sshll.u32 (!%p302_p8), %s2187_s10, 5 }
  0x17   : > { %305 = sbr.rel (%p302_p8) target bundleno = 765 (0x2fd), region = 48  ;;  %p368_p10 = scmp.lt.s32.totalorder (!%p302_p8), %s1602_s14, 127 }
  0x18   : > { %p1604_p12 = scmp.ne.s32.totalorder (!%p302_p8), %s2187_s10, 0 }
  0x1e   : > { %s346_s15 = scalar_select %p345_p9, %s2187_s10, 3 }
  0x1f   : > { %s2818_s14 = smov (!%p368_p10, %s1602_s14), 127  ;;  %378 = sbr.rel (%p1604_p12) target bundleno = 38 (0x26), region = 52 }
  0x20   : > { %s1600_s16 = sshll.u32 %s346_s15, 5  ;;  %s1603_s17 = sshll.u32 %s2818_s14, 3  ;;  %v2198_v0 = vmov (!%p1604_p12), 0.0  }
  0x21   : > { %p352_p11 = scmp.lt.s32.totalorder %s1600_s16, 112  ;;  %s2278_s20 = scalar_lea.vmem %s2805_s2, %s1603_s17  ;;  %379 = vst [vmem:[#allocation4] sm:$0x1] (!%p1604_p12), %v2198_v0  ;;  %380 = vst [vmem:[#allocation4 + $0x1] sm:$0x1] (!%p1604_p12), %v2198_v0 }
  0x22   : > { %381 = vst [vmem:[#allocation4 + $0x2] sm:$0x1] (!%p1604_p12), %v2198_v0 }
  0x23   : > { %s2820_s16 = smov (!%p352_p11, %s1600_s16), 112 }
  0x24   : > { %s1601_s21 = sshll.u32 %s2820_s16, 3 }
  0x25   : > { %s2283_s24 = scalar_lea.vmem %s2804_s1, %s1601_s21 }
  0x26 PF: > { %v414_v1 = vld [vmem:[%s2806_s3] sm:$0xff]  ;;  %v415_v2 = vld [vmem:[%s2806_s3 + $0x8] sm:$0xff]  ;;  %v416_v3 = vld [vmem:[%s2806_s3 + $0x10] sm:$0xff]  ;;  %vm433_vm0 = vcmask 785408   ;;  %p2768_p13 = scmp.eq.s32.totalorder %s1596_s0, 3 }
  0x27   : > { %v1891_v4 = vpack.c.bf16 %v415_v2, %v414_v1  ;;  %v417_v5 = vld [vmem:[%s2806_s3 + $0x18] sm:$0xff]  ;;  %v418_v7 = vld [vmem:[%s2806_s3 + $0x20] sm:$0xff]  ;;  %v419_v8 = vld [vmem:[%s2806_s3 + $0x28] sm:$0xff] }
  0x28   : > { %v1895_v6 = vpack.c.bf16 %v417_v5, %v416_v3  ;;  %v382_v9 = vld [vmem:[%s2283_s24] sm:$0xff]  ;;  %v1899_v10 = vpack.c.bf16 %v419_v8, %v418_v7  ;;  %v420_v11 = vld [vmem:[%s2806_s3 + $0x30] sm:$0xff]  ;;  %v421_v12 = vld [vmem:[%s2806_s3 + $0x38] sm:$0xff] }
  0x29   : > { %1892 = vmatprep.subr.bf16.mxu0 %v1891_v4  ;;  %1763 = vmatprep.mubr.msk.f32.mxu0 %vm433_vm0, %v382_v9  ;;  %v1903_v13 = vpack.c.bf16 %v421_v12, %v420_v11  ;;  %v422_v14 = vld [vmem:[%s2806_s3 + $0x40] sm:$0xff]  ;;  %v423_v15 = vld [vmem:[%s2806_s3 + $0x48] sm:$0xff]  ;;  %v424_v17 = vld [vmem:[%s2806_s3 + $0x50] sm:$0xff]  ;;  %v2199_v12 = vmov 0  }
  0x2a   : > { %1894 = vmatpush3.bf16.msra.mxu0 %v1891_v4  ;;  %v1907_v16 = vpack.c.bf16 %v423_v15, %v422_v14  ;;  %v425_v18 = vld [vmem:[%s2806_s3 + $0x58] sm:$0xff]  ;;  %v787_v19 = vld [vmem:[%s2808_s5] sm:$0xff]  ;;  %v788_v20 = vld [vmem:[%s2808_s5 + $0x8] sm:$0xff]  ;;  %2000 = vset.pattern.permute.xlu1 %v2199_v12 }
  0x2b   : > { %1896 = vmatprep.subr.bf16.mxu0 %v1895_v6  ;;  %v789_v21 = vld [vmem:[%s2808_s5 + $0x10] sm:$0xff]  ;;  %v790_v22 = vld [vmem:[%s2808_s5 + $0x18] sm:$0xff]  ;;  %v1915_v23 = vpack.c.bf16 %v788_v20, %v787_v19  ;;  %v1911_v24 = vpack.c.bf16 %v425_v18, %v424_v17  ;;  %v791_v26 = vld [vmem:[%s2808_s5 + $0x20] sm:$0xff]  ;;  %1999 = vset.pattern.permute.xlu0 %v2199_v12 }
  0x2c   : > { %v1919_v25 = vpack.c.bf16 %v790_v22, %v789_v21  ;;  %v792_v27 = vld [vmem:[%s2808_s5 + $0x28] sm:$0xff]  ;;  %v793_v30 = vld [vmem:[%s2808_s5 + $0x30] sm:$0xff]  ;;  %v794_v31 = vld [vmem:[%s2808_s5 + $0x38] sm:$0xff] }
  0x2d   : > { %1947 = vmatprep.subr.bf16.mxu1 %v1915_v23  ;;  %v1923_v28 = vpack.c.bf16 %v792_v27, %v791_v26  ;;  %v383_v29 = vld [vmem:[%s2283_s24 + $0x8] sm:$0xff]  ;;  %v384_v32 = vld [vmem:[%s2283_s24 + $0x10] sm:$0xff]  ;;  %v1927_v33 = vpack.c.bf16 %v794_v31, %v793_v30  ;;  %v385_v34 = vld [vmem:[%s2283_s24 + $0x18] sm:$0xff] }
  0x2e   : > { %1898 = vmatpush3.bf16.msra.mxu0 %v1895_v6  ;;  %1955 = vmatpush3.bf16.msra.mxu1 %v1915_v23  ;;  %v795_v35 = vld [vmem:[%s2808_s5 + $0x40] sm:$0xff]  ;;  %v796_v36 = vld [vmem:[%s2808_s5 + $0x48] sm:$0xff]  ;;  %v797_v40 = vld [vmem:[%s2808_s5 + $0x50] sm:$0xff] }
  0x2f   : > { %1900 = vmatprep.subr.bf16.mxu0 %v1899_v10  ;;  %1948 = vmatprep.subr.bf16.mxu1 %v1919_v25  ;;  %v386_v37 = vld [vmem:[%s2283_s24 + $0x20] sm:$0xff]  ;;  %v1931_v38 = vpack.c.bf16 %v796_v36, %v795_v35  ;;  %v387_v39 = vld [vmem:[%s2283_s24 + $0x28] sm:$0xff]  ;;  %v798_v41 = vld [vmem:[%s2808_s5 + $0x58] sm:$0xff] }
  0x30   : > { %v388_v42 = vld [vmem:[%s2283_s24 + $0x30] sm:$0xff]  ;;  %v1935_v43 = vpack.c.bf16 %v798_v41, %v797_v40  ;;  %v389_v44 = vld [vmem:[%s2283_s24 + $0x38] sm:$0xff]  ;;  %v390_v45 = vld [vmem:[%s2283_s24 + $0x40] sm:$0xff] }
  0x31   : > { %v391_v46 = vld [vmem:[%s2283_s24 + $0x48] sm:$0xff]  ;;  %v392_v47 = vld [vmem:[%s2283_s24 + $0x50] sm:$0xff]  ;;  %v393_v48 = vld [vmem:[%s2283_s24 + $0x58] sm:$0xff] }
  0x32   : > { %1902 = vmatpush3.bf16.msra.mxu0 %v1899_v10  ;;  %1956 = vmatpush3.bf16.msra.mxu1 %v1919_v25  ;;  %v394_v49 = vld [vmem:[%s2283_s24 + $0x60] sm:$0xff]  ;;  %v395_v50 = vld [vmem:[%s2283_s24 + $0x68] sm:$0xff]  ;;  %v396_v51 = vld [vmem:[%s2283_s24 + $0x70] sm:$0xff] }
  0x33   : > { %1904 = vmatprep.subr.bf16.mxu0 %v1903_v13  ;;  %1949 = vmatprep.subr.bf16.mxu1 %v1923_v28  ;;  %v397_v52 = vld [vmem:[%s2283_s24 + $0x78] sm:$0xff]  ;;  %v398_v53 = vld [vmem:[%s2283_s24 + $0x80] sm:$0xff]  ;;  %v399_v54 = vld [vmem:[%s2283_s24 + $0x88] sm:$0xff] }
  0x34   : > { %v400_v55 = vld [vmem:[%s2283_s24 + $0x90] sm:$0xff]  ;;  %v401_v56 = vld [vmem:[%s2283_s24 + $0x98] sm:$0xff]  ;;  %v402_v57 = vld [vmem:[%s2283_s24 + $0xa0] sm:$0xff] }
  0x35   : > { %v403_v58 = vld [vmem:[%s2283_s24 + $0xa8] sm:$0xff]  ;;  %v404_v59 = vld [vmem:[%s2283_s24 + $0xb0] sm:$0xff]  ;;  %v405_v60 = vld [vmem:[%s2283_s24 + $0xb8] sm:$0xff] }
  0x36   : > { %1906 = vmatpush3.bf16.msra.mxu0 %v1903_v13  ;;  %1957 = vmatpush3.bf16.msra.mxu1 %v1923_v28  ;;  %v406_v61 = vld [vmem:[%s2283_s24 + $0xc0] sm:$0xff]  ;;  %v407_v62 = vld [vmem:[%s2283_s24 + $0xc8] sm:$0xff]  ;;  %v408_v63 = vld [vmem:[%s2283_s24 + $0xd0] sm:$0xff] }
  0x37   : > { %1908 = vmatprep.subr.bf16.mxu0 %v1907_v16  ;;  %1950 = vmatprep.subr.bf16.mxu1 %v1927_v33  ;;  %v409_v0 = vld [vmem:[%s2283_s24 + $0xd8] sm:$0xff]  ;;  %v410_v1 = vld [vmem:[%s2283_s24 + $0xe0] sm:$0xff]  ;;  %v411_v2 = vld [vmem:[%s2283_s24 + $0xe8] sm:$0xff] }
  0x38   : > { %v412_v3 = vld [vmem:[%s2283_s24 + $0xf0] sm:$0xff]  ;;  %v413_v4 = vld [vmem:[%s2283_s24 + $0xf8] sm:$0xff]  ;;  %v799_v5 = vld [vmem:[%s2808_s5 + $0x60] sm:$0xff] }
  0x39   : > { %v800_v6 = vld [vmem:[%s2808_s5 + $0x68] sm:$0xff]  ;;  %v801_v8 = vld [vmem:[%s2808_s5 + $0x70] sm:$0xff]  ;;  %v802_v9 = vld [vmem:[%s2808_s5 + $0x78] sm:$0xff] }
  0x3a   : > { %1910 = vmatpush3.bf16.msra.mxu0 %v1907_v16  ;;  %1958 = vmatpush3.bf16.msra.mxu1 %v1927_v33  ;;  %v1939_v7 = vpack.c.bf16 %v800_v6, %v799_v5  ;;  %v1943_v10 = vpack.c.bf16 %v802_v9, %v801_v8  ;;  %v1174_v11 = vld [vmem:[%s2278_s20 + $0x8] sm:$0xff]  ;;  %v1175_v13 = vld [vmem:[%s2278_s20 + $0x10] sm:$0xff]  ;;  %v1176_v14 = vld [vmem:[%s2278_s20 + $0x18] sm:$0xff] }
  0x3b   : > { %1912 = vmatprep.subr.bf16.mxu0 %v1911_v24  ;;  %1951 = vmatprep.subr.bf16.mxu1 %v1931_v38  ;;  %v1173_v15 = vld [vmem:[%s2278_s20] sm:$0xff]  ;;  %v1182_v16 = vld [vmem:[%s2278_s20 + $0x48] sm:$0xff]  ;;  %v1184_v18 = vld [vmem:[%s2278_s20 + $0x58] sm:$0xff] }
  0x3c   : > { %1216 = vperm.xlu1 %2000, %v1174_v11   ;;  %1213 = vperm.xlu0 %1999, %v1173_v15   ;;  %v1177_v17 = vld [vmem:[%s2278_s20 + $0x20] sm:$0xff]  ;;  %v1178_v19 = vld [vmem:[%s2278_s20 + $0x28] sm:$0xff]  ;;  %v1179_v21 = vld [vmem:[%s2278_s20 + $0x30] sm:$0xff] }
  0x3d   : > { %v1186_v20 = vld [vmem:[%s2278_s20 + $0x68] sm:$0xff]  ;;  %v1188_v22 = vld [vmem:[%s2278_s20 + $0x78] sm:$0xff]  ;;  %v1183_v27 = vld [vmem:[%s2278_s20 + $0x50] sm:$0xff] }
  0x3e   : > { %1914 = vmatpush3.bf16.msra.mxu0 %v1911_v24  ;;  %1959 = vmatpush3.bf16.msra.mxu1 %v1931_v38  ;;  %v1190_v24 = vld [vmem:[%s2278_s20 + $0x88] sm:$0xff]  ;;  %v1192_v26 = vld [vmem:[%s2278_s20 + $0x98] sm:$0xff]  ;;  %v1187_v31 = vld [vmem:[%s2278_s20 + $0x70] sm:$0xff] }
  0x3f   : > { %1916 = vmatprep.subr.bf16.mxu0 %v1915_v23  ;;  %1952 = vmatprep.subr.bf16.mxu1 %v1935_v43  ;;  %v1196_v30 = vld [vmem:[%s2278_s20 + $0xb8] sm:$0xff]  ;;  %v1191_v35 = vld [vmem:[%s2278_s20 + $0x90] sm:$0xff]  ;;  %v1202_v36 = vld [vmem:[%s2278_s20 + $0xe8] sm:$0xff] }
  0x40   : > { %1219 = vperm.xlu1 %2000, %v1175_v13   ;;  %1240 = vperm.xlu0 %1999, %v1182_v16  }
  0x41   : > { %1764 = vmatmul.mubr.msk.f32.vlgmr.msra.gmra.mrb[0].mxu0 %vm433_vm0, %v383_v29  ;;  %v1185_v29 = vld [vmem:[%s2278_s20 + $0x60] sm:$0xff] }
  0x42   : > { %1766 = vmatprep.mubr.msk.f32.mxu0 %vm433_vm0, %v384_v32  ;;  %1918 = vmatpush3.bf16.msra.mxu0 %v1915_v23  ;;  %v1180_v23 = vld [vmem:[%s2278_s20 + $0x38] sm:$0xff]  ;;  %v1198_v32 = vld [vmem:[%s2278_s20 + $0xc8] sm:$0xff] }
  0x43   : > { %1920 = vmatprep.subr.bf16.mxu0 %v1919_v25  ;;  %1960 = vmatpush3.bf16.msra.mxu1 %v1935_v43 }
  0x44   : > { %1953 = vmatprep.subr.bf16.mxu1 %v1939_v7  ;;  %1222 = vperm.xlu1 %2000, %v1176_v14  }
  0x45   : > { %1767 = vmatmul.mubr.msk.f32.gmra.mrb[2].mxu0 %vm433_vm0, %v385_v34  ;;  %1246 = vperm.xlu0 %1999, %v1184_v18   ;;  %v1200_v34 = vld [vmem:[%s2278_s20 + $0xd8] sm:$0xff] }
  0x46   : > { %1769 = vmatprep.mubr.msk.f32.mxu0 %vm433_vm0, %v386_v37  ;;  %1922 = vmatpush3.bf16.msra.mxu0 %v1919_v25  ;;  %v1181_v25 = vld [vmem:[%s2278_s20 + $0x40] sm:$0xff] }
  0x47   : > { %1924 = vmatprep.subr.bf16.mxu0 %v1923_v28  ;;  %1961 = vmatpush3.bf16.msra.mxu1 %v1939_v7  ;;  %v1193_v37 = vld [vmem:[%s2278_s20 + $0xa0] sm:$0xff] }
  0x48   : > { %1954 = vmatprep.subr.bf16.mxu1 %v1943_v10  ;;  %1225 = vperm.xlu1 %2000, %v1177_v17  }
  0x49   : > { %1770 = vmatmul.mubr.msk.f32.gmra.mrb[4].mxu0 %vm433_vm0, %v387_v39  ;;  %1252 = vperm.xlu0 %1999, %v1186_v20   ;;  %v1195_v39 = vld [vmem:[%s2278_s20 + $0xb0] sm:$0xff] }
  0x4a   : > { %1772 = vmatprep.mubr.msk.f32.mxu0 %vm433_vm0, %v388_v42  ;;  %1926 = vmatpush3.bf16.msra.mxu0 %v1923_v28  ;;  %v1194_v28 = vld [vmem:[%s2278_s20 + $0xa8] sm:$0xff] }
  0x4b   : > { %1928 = vmatprep.subr.bf16.mxu0 %v1927_v33  ;;  %1962 = vmatpush3.bf16.msra.mxu1 %v1943_v10 }
  0x4c   : > { %1228 = vperm.xlu1 %2000, %v1178_v19  }
  0x4d   : > { %1773 = vmatmul.mubr.msk.f32.gmra.mrb[6].mxu0 %vm433_vm0, %v389_v44  ;;  %1258 = vperm.xlu0 %1999, %v1188_v22   ;;  %v1197_v44 = vld [vmem:[%s2278_s20 + $0xc0] sm:$0xff] }
  0x4e   : > { %1775 = vmatprep.mubr.msk.f32.mxu0 %vm433_vm0, %v390_v45  ;;  %1930 = vmatpush3.bf16.msra.mxu0 %v1927_v33  ;;  %v1189_v33 = vld [vmem:[%s2278_s20 + $0x80] sm:$0xff] }
  0x4f   : > { %1932 = vmatprep.subr.bf16.mxu0 %v1931_v38 }
  0x50   : > { %1231 = vperm.xlu1 %2000, %v1179_v21  }
  0x51   : > { %1776 = vmatmul.mubr.msk.f32.gmra.mrb[8].mxu0 %vm433_vm0, %v391_v46  ;;  %1264 = vperm.xlu0 %1999, %v1190_v24  }
  0x52   : > { %1778 = vmatprep.mubr.msk.f32.mxu0 %vm433_vm0, %v392_v47  ;;  %1934 = vmatpush3.bf16.msra.mxu0 %v1931_v38  ;;  %v2463_v38 = vld [vmem:[%s2807_s4] ss:$0 sm:$0xff] }
  0x53   : > { %1936 = vmatprep.subr.bf16.mxu0 %v1935_v43 }
  0x54   : > { %1234 = vperm.xlu1 %2000, %v1180_v23  }
  0x55   : > { %1779 = vmatmul.mubr.msk.f32.gmra.mrb[10].mxu0 %vm433_vm0, %v393_v48  ;;  %1270 = vperm.xlu0 %1999, %v1192_v26  }
  0x56   : > { %1781 = vmatprep.mubr.msk.f32.mxu0 %vm433_vm0, %v394_v49  ;;  %1938 = vmatpush3.bf16.msra.mxu0 %v1935_v43  ;;  %v1199_v49 = vld [vmem:[%s2278_s20 + $0xd0] sm:$0xff] }
  0x57   : > { %1940 = vmatprep.subr.bf16.mxu0 %v1939_v7 }
  0x58   : > { %1237 = vperm.xlu1 %2000, %v1181_v25  }
  0x59   : > { %1782 = vmatmul.mubr.msk.f32.gmra.mrb[12].mxu0 %vm433_vm0, %v395_v50  ;;  %1276 = vperm.xlu0 %1999, %v1194_v28  }
  0x5a   : > { %1784 = vmatprep.mubr.msk.f32.mxu0 %vm433_vm0, %v396_v51  ;;  %1942 = vmatpush3.bf16.msra.mxu0 %v1939_v7 }
  0x5b   : > { %1944 = vmatprep.subr.bf16.mxu0 %v1943_v10 }
  0x5c   : > { %1243 = vperm.xlu1 %2000, %v1183_v27  }
  0x5d   : > { %1785 = vmatmul.mubr.msk.f32.gmra.mrb[14].mxu0 %vm433_vm0, %v397_v52  ;;  %1282 = vperm.xlu0 %1999, %v1196_v30  }
  0x5e   : > { %1787 = vmatprep.mubr.msk.f32.mxu0 %vm433_vm0, %v398_v53  ;;  %1946 = vmatpush3.bf16.msra.mxu0 %v1943_v10 }
  0x60   : > { %1249 = vperm.xlu1 %2000, %v1185_v29  }
  0x61   : > { %1788 = vmatmul.mubr.msk.f32.gmra.mrb[16].mxu0 %vm433_vm0, %v399_v54  ;;  %1288 = vperm.xlu0 %1999, %v1198_v32   ;;  %v1201_v54 = vld [vmem:[%s2278_s20 + $0xe0] sm:$0xff] }
  0x62   : > { %1790 = vmatprep.mubr.msk.f32.mxu0 %vm433_vm0, %v400_v55 }
  0x64   : > { %1255 = vperm.xlu1 %2000, %v1187_v31  }
  0x65   : > { %1791 = vmatmul.mubr.msk.f32.gmra.mrb[18].mxu0 %vm433_vm0, %v401_v56  ;;  %1294 = vperm.xlu0 %1999, %v1200_v34  }
  0x66   : > { %1793 = vmatprep.mubr.msk.f32.mxu0 %vm433_vm0, %v402_v57 }
  0x68   : > { %1261 = vperm.xlu1 %2000, %v1189_v33  }
  0x69   : > { %1794 = vmatmul.mubr.msk.f32.gmra.mrb[20].mxu0 %vm433_vm0, %v403_v58  ;;  %1300 = vperm.xlu0 %1999, %v1202_v36  }
  0x6a   : > { %1796 = vmatprep.mubr.msk.f32.mxu0 %vm433_vm0, %v404_v59 }
  0x6c   : > { %1267 = vperm.xlu1 %2000, %v1191_v35  }
  0x6d   : > { %1797 = vmatmul.mubr.msk.f32.gmra.mrb[22].mxu0 %vm433_vm0, %v405_v60 }
  0x6e   : > { %1799 = vmatprep.mubr.msk.f32.mxu0 %vm433_vm0, %v406_v61 }
  0x70   : > { %1273 = vperm.xlu1 %2000, %v1193_v37  }
  0x71   : > { %1800 = vmatmul.mubr.msk.f32.gmra.mrb[24].mxu0 %vm433_vm0, %v407_v62 }
  0x72   : > { %1802 = vmatprep.mubr.msk.f32.mxu0 %vm433_vm0, %v408_v63 }
  0x74   : > { %1279 = vperm.xlu1 %2000, %v1195_v39  }
  0x75   : > { %1803 = vmatmul.mubr.msk.f32.gmra.mrb[26].mxu0 %vm433_vm0, %v409_v0 }
  0x76   : > { %1805 = vmatprep.mubr.msk.f32.mxu0 %vm433_vm0, %v410_v1 }
  0x78   : > { %1285 = vperm.xlu1 %2000, %v1197_v44  }
  0x79   : > { %1806 = vmatmul.mubr.msk.f32.gmra.mrb[28].mxu0 %vm433_vm0, %v411_v2 }
  0x7a   : > { %1808 = vmatprep.mubr.msk.f32.mxu0 %vm433_vm0, %v412_v3 }
  0x7c   : > { %1291 = vperm.xlu1 %2000, %v1199_v49  }
  0x7d   : > { %1809 = vmatmul.mubr.msk.f32.gmra.mrb[30].mxu0 %vm433_vm0, %v413_v4 }
  0x80   : > { %1297 = vperm.xlu1 %2000, %v1201_v54  }
 0x114   : > { %v1765_v40 = vpop.f32.mrb[0].mxu0 }
 0x115   : > { %v602_v41 = vadd.f32 %v1765_v40, %v2463_v38  ;;  %v596_v42 = vpop.f32.mrb[1].mxu0 }
 0x116   : > { %v597_v43 = vadd.f32 %v2463_v38, %v596_v42 }
 0x118   : > { %2001 = vtanh.f32 %v597_v43  ;;  %v1768_v45 = vpop.f32.mrb[2].mxu0 }
 0x119   : > { %2003 = vtanh.f32 %v602_v41  ;;  %v612_v46 = vadd.f32 %v1768_v45, %v2463_v38  ;;  %v606_v47 = vpop.f32.mrb[3].mxu0 }
 0x11a   : > { %v607_v48 = vadd.f32 %v2463_v38, %v606_v47 }
 0x11c   : > { %2005 = vtanh.f32 %v607_v48  ;;  %v1771_v50 = vpop.f32.mrb[4].mxu0 }
 0x11d   : > { %2007 = vtanh.f32 %v612_v46  ;;  %v622_v51 = vadd.f32 %v1771_v50, %v2463_v38  ;;  %v616_v52 = vpop.f32.mrb[5].mxu0 }
 0x11e   : > { %v617_v53 = vadd.f32 %v2463_v38, %v616_v52 }
 0x11f   : > { %2009 = vtanh.f32 %v622_v51 }
 0x120   : > { %2011 = vtanh.f32 %v617_v53  ;;  %v1774_v55 = vpop.f32.mrb[6].mxu0 }
 0x121   : > { %v632_v56 = vadd.f32 %v1774_v55, %v2463_v38  ;;  %v626_v57 = vpop.f32.mrb[7].mxu0 }
 0x122   : > { %v2002_v58 = vpop.eup %2001  ;;  %v627_v59 = vadd.f32 %v2463_v38, %v626_v57 }
 0x123   : > { %v2004_v60 = vpop.eup %2003  ;;  %2013 = vtanh.f32 %v632_v56  ;;  %1843 = vmatprep.mubr.f32.mxu0 %v2002_v58 }
 0x124   : > { %2015 = vtanh.f32 %v627_v59  ;;  %v1777_v61 = vpop.f32.mrb[8].mxu0  ;;  %1844 = vmatmul.mubr.f32.vlgmr.msra.gmra.mrb[32].mxu0 %v2004_v60 }
 0x125   : > { %v642_v62 = vadd.f32 %v1777_v61, %v2463_v38  ;;  %v636_v63 = vpop.f32.mrb[9].mxu0 }
 0x126   : > { %v2006_v0 = vpop.eup %2005  ;;  %v637_v1 = vadd.f32 %v2463_v38, %v636_v63 }
 0x127   : > { %v2008_v2 = vpop.eup %2007  ;;  %2017 = vtanh.f32 %v642_v62  ;;  %1846 = vmatprep.mubr.f32.mxu1 %v2006_v0 }
 0x128   : > { %2019 = vtanh.f32 %v637_v1  ;;  %v1780_v3 = vpop.f32.mrb[10].mxu0  ;;  %1847 = vmatmul.mubr.f32.vlgmr.msra.gmra.mrb[0].mxu1 %v2008_v2 }
 0x129   : > { %v2010_v4 = vpop.eup %2009  ;;  %v652_v5 = vadd.f32 %v1780_v3, %v2463_v38  ;;  %v646_v6 = vpop.f32.mrb[11].mxu0 }
 0x12a   : > { %v2012_v7 = vpop.eup %2011  ;;  %v647_v8 = vadd.f32 %v2463_v38, %v646_v6 }
 0x12b   : > { %2021 = vtanh.f32 %v652_v5  ;;  %1849 = vmatprep.mubr.f32.mxu1 %v2012_v7 }
 0x12c   : > { %2023 = vtanh.f32 %v647_v8  ;;  %v1783_v9 = vpop.f32.mrb[12].mxu0  ;;  %1850 = vmatmul.mubr.f32.gmra.mrb[2].mxu1 %v2010_v4 }
 0x12d   : > { %v2014_v10 = vpop.eup %2013  ;;  %v662_v11 = vadd.f32 %v1783_v9, %v2463_v38  ;;  %v656_v12 = vpop.f32.mrb[13].mxu0 }
 0x12e   : > { %v2016_v13 = vpop.eup %2015  ;;  %v657_v14 = vadd.f32 %v2463_v38, %v656_v12 }
 0x12f   : > { %2025 = vtanh.f32 %v662_v11  ;;  %1852 = vmatprep.mubr.f32.mxu1 %v2016_v13 }
 0x130   : > { %2027 = vtanh.f32 %v657_v14  ;;  %v1786_v15 = vpop.f32.mrb[14].mxu0  ;;  %1853 = vmatmul.mubr.f32.gmra.mrb[4].mxu1 %v2014_v10 }
 0x131   : > { %v2018_v16 = vpop.eup %2017  ;;  %v672_v17 = vadd.f32 %v1786_v15, %v2463_v38  ;;  %v666_v18 = vpop.f32.mrb[15].mxu0 }
 0x132   : > { %v2020_v19 = vpop.eup %2019  ;;  %v667_v20 = vadd.f32 %v2463_v38, %v666_v18 }
 0x133   : > { %2029 = vtanh.f32 %v672_v17  ;;  %1855 = vmatprep.mubr.f32.mxu1 %v2020_v19 }
 0x134   : > { %2031 = vtanh.f32 %v667_v20  ;;  %v1789_v21 = vpop.f32.mrb[16].mxu0  ;;  %1856 = vmatmul.mubr.f32.gmra.mrb[6].mxu1 %v2018_v16 }
 0x135   : > { %v2022_v22 = vpop.eup %2021  ;;  %v682_v23 = vadd.f32 %v1789_v21, %v2463_v38  ;;  %v676_v24 = vpop.f32.mrb[17].mxu0 }
 0x136   : > { %v2024_v25 = vpop.eup %2023  ;;  %v677_v26 = vadd.f32 %v2463_v38, %v676_v24  ;;  %v2515_v24 = vld [vmem:[%s2810_s7] ss:$0 sm:$0xff] }
 0x137   : > { %2033 = vtanh.f32 %v682_v23  ;;  %1858 = vmatprep.mubr.f32.mxu1 %v2024_v25 }
 0x138   : > { %2035 = vtanh.f32 %v677_v26  ;;  %v1792_v27 = vpop.f32.mrb[18].mxu0  ;;  %1859 = vmatmul.mubr.f32.gmra.mrb[8].mxu1 %v2022_v22 }
 0x139   : > { %v2026_v28 = vpop.eup %2025  ;;  %v692_v29 = vadd.f32 %v1792_v27, %v2463_v38  ;;  %v686_v30 = vpop.f32.mrb[19].mxu0 }
 0x13a   : > { %v2028_v31 = vpop.eup %2027  ;;  %v687_v32 = vadd.f32 %v2463_v38, %v686_v30 }
 0x13b   : > { %2037 = vtanh.f32 %v692_v29  ;;  %1861 = vmatprep.mubr.f32.mxu1 %v2028_v31 }
 0x13c   : > { %2039 = vtanh.f32 %v687_v32  ;;  %v1795_v33 = vpop.f32.mrb[20].mxu0  ;;  %1862 = vmatmul.mubr.f32.gmra.mrb[10].mxu1 %v2026_v28 }
 0x13d   : > { %v2030_v34 = vpop.eup %2029  ;;  %v702_v35 = vadd.f32 %v1795_v33, %v2463_v38  ;;  %v696_v36 = vpop.f32.mrb[21].mxu0 }
 0x13e   : > { %v2032_v37 = vpop.eup %2031  ;;  %v697_v39 = vadd.f32 %v2463_v38, %v696_v36 }
 0x13f   : > { %2041 = vtanh.f32 %v702_v35  ;;  %1864 = vmatprep.mubr.f32.mxu1 %v2032_v37 }
 0x140   : > { %2043 = vtanh.f32 %v697_v39  ;;  %v1798_v40 = vpop.f32.mrb[22].mxu0  ;;  %1865 = vmatmul.mubr.f32.gmra.mrb[12].mxu1 %v2030_v34 }
 0x141   : > { %v2034_v41 = vpop.eup %2033  ;;  %v712_v42 = vadd.f32 %v1798_v40, %v2463_v38  ;;  %v706_v43 = vpop.f32.mrb[23].mxu0 }
 0x142   : > { %v2036_v44 = vpop.eup %2035  ;;  %v707_v45 = vadd.f32 %v2463_v38, %v706_v43 }
 0x143   : > { %2045 = vtanh.f32 %v712_v42  ;;  %1867 = vmatprep.mubr.f32.mxu1 %v2036_v44 }
 0x144   : > { %2047 = vtanh.f32 %v707_v45  ;;  %v1801_v46 = vpop.f32.mrb[24].mxu0  ;;  %1868 = vmatmul.mubr.f32.gmra.mrb[14].mxu1 %v2034_v41 }
 0x145   : > { %v2038_v47 = vpop.eup %2037  ;;  %v722_v48 = vadd.f32 %v1801_v46, %v2463_v38  ;;  %v716_v49 = vpop.f32.mrb[25].mxu0 }
 0x146   : > { %v2040_v50 = vpop.eup %2039  ;;  %v717_v51 = vadd.f32 %v2463_v38, %v716_v49 }
 0x147   : > { %2049 = vtanh.f32 %v722_v48  ;;  %1870 = vmatprep.mubr.f32.mxu1 %v2040_v50 }
 0x148   : > { %2051 = vtanh.f32 %v717_v51  ;;  %v1804_v52 = vpop.f32.mrb[26].mxu0  ;;  %1871 = vmatmul.mubr.f32.gmra.mrb[16].mxu1 %v2038_v47 }
 0x149   : > { %v2042_v53 = vpop.eup %2041  ;;  %v732_v54 = vadd.f32 %v1804_v52, %v2463_v38  ;;  %v726_v55 = vpop.f32.mrb[27].mxu0 }
 0x14a   : > { %v2044_v56 = vpop.eup %2043  ;;  %v727_v57 = vadd.f32 %v2463_v38, %v726_v55 }
 0x14b   : > { %2053 = vtanh.f32 %v732_v54  ;;  %1873 = vmatprep.mubr.f32.mxu1 %v2044_v56 }
 0x14c   : > { %2055 = vtanh.f32 %v727_v57  ;;  %v1807_v58 = vpop.f32.mrb[28].mxu0  ;;  %1874 = vmatmul.mubr.f32.gmra.mrb[18].mxu1 %v2042_v53 }
 0x14d   : > { %v2046_v59 = vpop.eup %2045  ;;  %v742_v60 = vadd.f32 %v1807_v58, %v2463_v38  ;;  %v736_v61 = vpop.f32.mrb[29].mxu0 }
 0x14e   : > { %v2048_v62 = vpop.eup %2047  ;;  %v737_v63 = vadd.f32 %v2463_v38, %v736_v61 }
 0x14f   : > { %2057 = vtanh.f32 %v742_v60  ;;  %1876 = vmatprep.mubr.f32.mxu1 %v2048_v62 }
 0x150   : > { %2059 = vtanh.f32 %v737_v63  ;;  %v1810_v0 = vpop.f32.mrb[30].mxu0  ;;  %1877 = vmatmul.mubr.f32.gmra.mrb[20].mxu1 %v2046_v59 }
 0x151   : > { %v2050_v1 = vpop.eup %2049  ;;  %v752_v2 = vadd.f32 %v1810_v0, %v2463_v38  ;;  %v746_v3 = vpop.f32.mrb[31].mxu0 }
 0x152   : > { %v2052_v4 = vpop.eup %2051  ;;  %v747_v5 = vadd.f32 %v2463_v38, %v746_v3  ;;  %v2504_v38 = vld [vmem:[%s2809_s6] ss:$0 sm:$0xff] }
 0x153   : > { %2061 = vtanh.f32 %v752_v2  ;;  %1879 = vmatprep.mubr.f32.mxu1 %v2052_v4 }
 0x154   : > { %2063 = vtanh.f32 %v747_v5  ;;  %1880 = vmatmul.mubr.f32.gmra.mrb[22].mxu1 %v2050_v1 }
 0x155   : > { %v2054_v6 = vpop.eup %2053 }
 0x156   : > { %v2056_v7 = vpop.eup %2055 }
 0x157   : > { %1882 = vmatprep.mubr.f32.mxu1 %v2056_v7 }
 0x158   : > { %1883 = vmatmul.mubr.f32.gmra.mrb[24].mxu1 %v2054_v6 }
 0x159   : > { %v2058_v8 = vpop.eup %2057 }
 0x15a   : > { %v2060_v9 = vpop.eup %2059 }
 0x15b   : > { %1885 = vmatprep.mubr.f32.mxu1 %v2060_v9 }
 0x15c   : > { %1886 = vmatmul.mubr.f32.gmra.mrb[26].mxu1 %v2058_v8 }
 0x15d   : > { %v2062_v10 = vpop.eup %2061 }
 0x15e   : > { %v2064_v11 = vpop.eup %2063 }
 0x15f   : > { %1888 = vmatprep.mubr.f32.mxu1 %v2064_v11 }
 0x160   : > { %1889 = vmatmul.mubr.f32.gmra.mrb[28].mxu1 %v2062_v10 }
 0x1f7   : > { %v1845_v12 = vpop.f32.mrb[32].mxu0 }
 0x1f8   : > { %v882_v13 = vadd.f32 %v1845_v12, %v2504_v38  ;;  %v876_v14 = vpop.f32.mrb[33].mxu0 }
 0x1f9   : > { %v877_v15 = vadd.f32 %v2504_v38, %v876_v14 }
 0x1fa   : > { %2065 = vtanh.f32 %v882_v13 }
 0x1fb   : > { %v1848_v16 = vpop.f32.mrb[0].mxu1  ;;  %2067 = vtanh.f32 %v877_v15 }
 0x1fc   : > { %v892_v17 = vadd.f32 %v1848_v16, %v2504_v38  ;;  %v886_v18 = vpop.f32.mrb[1].mxu1 }
 0x1fd   : > { %v887_v19 = vadd.f32 %v2504_v38, %v886_v18 }
 0x1fe   : > { %2069 = vtanh.f32 %v892_v17 }
 0x1ff   : > { %v1851_v20 = vpop.f32.mrb[2].mxu1  ;;  %2071 = vtanh.f32 %v887_v19 }
 0x200   : > { %v902_v21 = vadd.f32 %v1851_v20, %v2504_v38  ;;  %v896_v22 = vpop.f32.mrb[3].mxu1 }
 0x201   : > { %v897_v23 = vadd.f32 %v2504_v38, %v896_v22 }
 0x203   : > { %2073 = vtanh.f32 %v897_v23  ;;  %v1854_v25 = vpop.f32.mrb[4].mxu1 }
 0x204   : > { %v2066_v26 = vpop.eup %2065  ;;  %2075 = vtanh.f32 %v902_v21  ;;  %v912_v27 = vadd.f32 %v1854_v25, %v2504_v38  ;;  %v906_v28 = vpop.f32.mrb[5].mxu1 }
 0x205   : > { %v907_v29 = vadd.f32 %v2504_v38, %v906_v28  ;;  %v1075_v30 = vmul.f32 %v2066_v26, %v2515_v24  ;;  %v2068_v31 = vpop.eup %2067 }
 0x206   : > { %v1074_v39 = vmul.f32 %v2068_v31, %v2515_v24 }
 0x207   : > { %2077 = vtanh.f32 %v907_v29  ;;  %v1857_v32 = vpop.f32.mrb[6].mxu1  ;;  %1108 = vadd.xlane.f32.xlu0 %v1075_v30 }
 0x208   : > { %v2070_v33 = vpop.eup %2069  ;;  %2079 = vtanh.f32 %v912_v27  ;;  %v922_v34 = vadd.f32 %v1857_v32, %v2504_v38  ;;  %v916_v35 = vpop.f32.mrb[7].mxu1 }
 0x209   : > { %v917_v36 = vadd.f32 %v2504_v38, %v916_v35  ;;  %v1077_v37 = vmul.f32 %v2070_v33, %v2515_v24  ;;  %v2072_v40 = vpop.eup %2071 }
 0x20a   : > { %v1076_v46 = vmul.f32 %v2072_v40, %v2515_v24 }
 0x20b   : > { %2081 = vtanh.f32 %v917_v36  ;;  %1112 = vadd.xlane.f32.xlu1 %v1077_v37  ;;  %v1860_v41 = vpop.f32.mrb[8].mxu1  ;;  %1106 = vadd.xlane.f32.xlu0 %v1074_v39 }
 0x20c   : > { %2083 = vtanh.f32 %v922_v34  ;;  %v932_v42 = vadd.f32 %v1860_v41, %v2504_v38  ;;  %v926_v43 = vpop.f32.mrb[9].mxu1 }
 0x20d   : > { %v2074_v44 = vpop.eup %2073  ;;  %v927_v45 = vadd.f32 %v2504_v38, %v926_v43 }
 0x20e   : > { %v2076_v47 = vpop.eup %2075  ;;  %v1078_v48 = vmul.f32 %v2074_v44, %v2515_v24 }
 0x20f   : > { %2085 = vtanh.f32 %v927_v45  ;;  %v1863_v49 = vpop.f32.mrb[10].mxu1  ;;  %1110 = vadd.xlane.f32.xlu1 %v1076_v46  ;;  %v1079_v54 = vmul.f32 %v2076_v47, %v2515_v24 }
 0x210   : > { %2087 = vtanh.f32 %v932_v42  ;;  %v942_v50 = vadd.f32 %v1863_v49, %v2504_v38  ;;  %v936_v51 = vpop.f32.mrb[11].mxu1  ;;  %1114 = vadd.xlane.f32.xlu0 %v1078_v48 }
 0x211   : > { %v2078_v52 = vpop.eup %2077  ;;  %v937_v53 = vadd.f32 %v2504_v38, %v936_v51 }
 0x212   : > { %v2080_v55 = vpop.eup %2079  ;;  %v1080_v56 = vmul.f32 %v2078_v52, %v2515_v24 }
 0x213   : > { %2089 = vtanh.f32 %v937_v53  ;;  %v1866_v57 = vpop.f32.mrb[12].mxu1  ;;  %1116 = vadd.xlane.f32.xlu1 %v1079_v54  ;;  %v1081_v62 = vmul.f32 %v2080_v55, %v2515_v24 }
 0x214   : > { %2091 = vtanh.f32 %v942_v50  ;;  %v952_v58 = vadd.f32 %v1866_v57, %v2504_v38  ;;  %v946_v59 = vpop.f32.mrb[13].mxu1  ;;  %1118 = vadd.xlane.f32.xlu0 %v1080_v56  ;;  %v2559_v50 = vpop.permute.xlu1 %1216 }
 0x215   : > { %v2082_v60 = vpop.eup %2081  ;;  %v947_v61 = vadd.f32 %v2504_v38, %v946_v59 }
 0x216   : > { %v2084_v63 = vpop.eup %2083  ;;  %v1082_v0 = vmul.f32 %v2082_v60, %v2515_v24 }
 0x217   : > { %2093 = vtanh.f32 %v947_v61  ;;  %v1869_v1 = vpop.f32.mrb[14].mxu1  ;;  %1120 = vadd.xlane.f32.xlu1 %v1081_v62  ;;  %v1083_v6 = vmul.f32 %v2084_v63, %v2515_v24 }
 0x218   : > { %2095 = vtanh.f32 %v952_v58  ;;  %v962_v2 = vadd.f32 %v1869_v1, %v2504_v38  ;;  %v956_v3 = vpop.f32.mrb[15].mxu1  ;;  %1122 = vadd.xlane.f32.xlu0 %v1082_v0  ;;  %v2566_v61 = vpop.permute.xlu1 %1219 }
 0x219   : > { %v2086_v4 = vpop.eup %2085  ;;  %v957_v5 = vadd.f32 %v2504_v38, %v956_v3 }
 0x21a   : > { %v2088_v7 = vpop.eup %2087  ;;  %v1084_v8 = vmul.f32 %v2086_v4, %v2515_v24 }
 0x21b   : > { %2097 = vtanh.f32 %v957_v5  ;;  %v1872_v9 = vpop.f32.mrb[16].mxu1  ;;  %1124 = vadd.xlane.f32.xlu1 %v1083_v6  ;;  %v1085_v14 = vmul.f32 %v2088_v7, %v2515_v24 }
 0x21c   : > { %2099 = vtanh.f32 %v962_v2  ;;  %v972_v10 = vadd.f32 %v1872_v9, %v2504_v38  ;;  %v966_v11 = vpop.f32.mrb[17].mxu1  ;;  %1126 = vadd.xlane.f32.xlu0 %v1084_v8  ;;  %v2573_v8 = vpop.permute.xlu1 %1222 }
 0x21d   : > { %v2090_v12 = vpop.eup %2089  ;;  %v967_v13 = vadd.f32 %v2504_v38, %v966_v11 }
 0x21e   : > { %v2092_v15 = vpop.eup %2091  ;;  %v1086_v16 = vmul.f32 %v2090_v12, %v2515_v24 }
 0x21f   : > { %2101 = vtanh.f32 %v967_v13  ;;  %v1875_v17 = vpop.f32.mrb[18].mxu1  ;;  %1128 = vadd.xlane.f32.xlu1 %v1085_v14  ;;  %v1087_v22 = vmul.f32 %v2092_v15, %v2515_v24 }
 0x220   : > { %2103 = vtanh.f32 %v972_v10  ;;  %v982_v18 = vadd.f32 %v1875_v17, %v2504_v38  ;;  %v976_v19 = vpop.f32.mrb[19].mxu1  ;;  %1130 = vadd.xlane.f32.xlu0 %v1086_v16  ;;  %v2578_v14 = vpop.permute.xlu1 %1225 }
 0x221   : > { %v2094_v20 = vpop.eup %2093  ;;  %v977_v21 = vadd.f32 %v2504_v38, %v976_v19 }
 0x222   : > { %v2096_v23 = vpop.eup %2095  ;;  %v1088_v25 = vmul.f32 %v2094_v20, %v2515_v24 }
 0x223   : > { %2105 = vtanh.f32 %v977_v21  ;;  %v1878_v26 = vpop.f32.mrb[20].mxu1  ;;  %1132 = vadd.xlane.f32.xlu1 %v1087_v22  ;;  %v1089_v31 = vmul.f32 %v2096_v23, %v2515_v24  ;;  %v1214_v21 = vpop.permute.xlu0 %1213 }
 0x224   : > { %2107 = vtanh.f32 %v982_v18  ;;  %v992_v27 = vadd.f32 %v1878_v26, %v2504_v38  ;;  %v986_v28 = vpop.f32.mrb[21].mxu1  ;;  %1134 = vadd.xlane.f32.xlu0 %v1088_v25  ;;  %v2583_v19 = vpop.permute.xlu1 %1228  ;;  %v1203_v25 = vld [vmem:[%s2278_s20 + $0xf0] sm:$0xff]  ;;  %v1204_v26 = vld [vmem:[%s2278_s20 + $0xf8] sm:$0xff]  ;;  %s2626_s20 = sld [smem:[#allocation3 + %s2187_s10]]  ;;  %s2200_s10 = smov [#allocation4]  }
 0x225   : > { %v2098_v29 = vpop.eup %2097  ;;  %v987_v30 = vadd.f32 %v2504_v38, %v986_v28  ;;  %s1528_s22 = sshll.u32 %s2200_s10, 4  ;;  %s1529_s22 = int_to_ptr.vmem [resolvable:$true] %s1528_s22 }
 0x226   : > { %v2100_v32 = vpop.eup %2099  ;;  %v1090_v33 = vmul.f32 %v2098_v29, %v2515_v24  ;;  %s2141_s26 = scalar_lea.vmem %s1529_s22, 48  ;;  %s2147_s27 = scalar_lea.vmem %s1529_s22, 64 }
 0x227   : > { %2109 = vtanh.f32 %v987_v30  ;;  %v1881_v34 = vpop.f32.mrb[22].mxu1  ;;  %1136 = vadd.xlane.f32.xlu1 %v1089_v31  ;;  %v1091_v40 = vmul.f32 %v2100_v32, %v2515_v24  ;;  %v2589_v23 = vpop.permute.xlu0 %1240  ;;  %p2142_p0 = scmp.ne.s32.totalorder %s1529_s22, %s2141_s26  ;;  %p2148_p3 = scmp.lt.s32.totalorder %s1529_s22, %s1529_s22 }
 0x228   : > { %2111 = vtanh.f32 %v992_v27  ;;  %v1002_v35 = vadd.f32 %v1881_v34, %v2504_v38  ;;  %v996_v36 = vpop.f32.mrb[23].mxu1  ;;  %1138 = vadd.xlane.f32.xlu0 %v1090_v33  ;;  %v2585_v20 = vpop.permute.xlu1 %1231  ;;  %p2149_p4 = scmp.lt.s32.totalorder %s2147_s27, %s2141_s26 }
 0x229   : > { %v2102_v37 = vpop.eup %2101  ;;  %v997_v39 = vadd.f32 %v2504_v38, %v996_v36  ;;  %p2143_p1 = pnand %p2142_p0, %p2768_p13 }
 0x22a   : > { %v2104_v41 = vpop.eup %2103  ;;  %v1092_v42 = vmul.f32 %v2102_v37, %v2515_v24  ;;  %s1640_s21 = sshll.u32 %s2626_s20, 7  ;;  %s1510_s23 = scalar_lea.vmem [#allocation4], %s2626_s20 }
 0x22b   : > { %2113 = vtanh.f32 %v997_v39  ;;  %v1884_v43 = vpop.f32.mrb[24].mxu1  ;;  %1140 = vadd.xlane.f32.xlu1 %v1091_v40  ;;  %v1093_v48 = vmul.f32 %v2104_v41, %v2515_v24  ;;  %v2595_v28 = vpop.permute.xlu0 %1246  ;;  %p2144_p2 = pneg %p2143_p1  ;;  %p2150_p5 = por %p2149_p4, %p2148_p3 }
 0x22c   : > { %2115 = vtanh.f32 %v1002_v35  ;;  %v1012_v44 = vadd.f32 %v1884_v43, %v2504_v38  ;;  %v1006_v45 = vpop.f32.mrb[25].mxu1  ;;  %1142 = vadd.xlane.f32.xlu0 %v1092_v42  ;;  %v2587_v22 = vpop.permute.xlu1 %1234 }
 0x22d   : > { %v2106_v46 = vpop.eup %2105  ;;  %v1007_v47 = vadd.f32 %v2504_v38, %v1006_v45  ;;  %p2151_p6 = pnand %p2150_p5, %p2144_p2 }
 0x22e   : > { %v2108_v49 = vpop.eup %2107  ;;  %v1094_v51 = vmul.f32 %v2106_v46, %v2515_v24 }
 0x22f   : > { %2117 = vtanh.f32 %v1007_v47  ;;  %v1887_v52 = vpop.f32.mrb[26].mxu1  ;;  %1144 = vadd.xlane.f32.xlu1 %v1093_v48  ;;  %v1095_v57 = vmul.f32 %v2108_v49, %v2515_v24  ;;  %v2599_v29 = vpop.permute.xlu0 %1252 }
 0x230   : > { %2119 = vtanh.f32 %v1012_v44  ;;  %v1022_v53 = vadd.f32 %v1887_v52, %v2504_v38  ;;  %v1016_v54 = vpop.f32.mrb[27].mxu1  ;;  %1146 = vadd.xlane.f32.xlu0 %v1094_v51  ;;  %v2593_v27 = vpop.permute.xlu1 %1237  ;;  %v1205_v44 = vlaneseq  ;;  %v1209_v51 = vstv %s1640_s21 }
 0x231   : > { %v2110_v55 = vpop.eup %2109  ;;  %v1017_v56 = vadd.f32 %v2504_v38, %v1016_v54 }
 0x232   : > { %v2112_v58 = vpop.eup %2111  ;;  %v1096_v59 = vmul.f32 %v2110_v55, %v2515_v24  ;;  %v1206_v46 = vand.u32 127, %v1205_v44 }
 0x233   : > { %2121 = vtanh.f32 %v1017_v56  ;;  %v1890_v60 = vpop.f32.mrb[28].mxu1  ;;  %1148 = vadd.xlane.f32.xlu1 %v1095_v57  ;;  %v1097_v2 = vmul.f32 %v2112_v58, %v2515_v24  ;;  %v2603_v31 = vpop.permute.xlu0 %1258 }
 0x234   : > { %2123 = vtanh.f32 %v1022_v53  ;;  %v1032_v62 = vadd.f32 %v1890_v60, %v2504_v38  ;;  %v1026_v63 = vpop.f32.mrb[29].mxu1  ;;  %1150 = vadd.xlane.f32.xlu0 %v1096_v59  ;;  %v1207_v49 = vadd.s32 128, %v1206_v46  ;;  %v2639_v54 = vadd.s32 %v1209_v51, %v1206_v46 }
 0x235   : > { %v2114_v0 = vpop.eup %2113  ;;  %v1027_v1 = vadd.f32 %v2504_v38, %v1026_v63 }
 0x236   : > { %v2116_v3 = vpop.eup %2115  ;;  %2125 = vtanh.f32 %v1032_v62  ;;  %v1098_v4 = vmul.f32 %v2114_v0, %v2515_v24  ;;  %v2641_v55 = vadd.s32 %v1209_v51, %v1207_v49  ;;  %vm1308_vm1 = vcmp.eq.s32.totalorder %v1214_v21, %v2639_v54 }
 0x237   : > { %2127 = vtanh.f32 %v1027_v1  ;;  %1152 = vadd.xlane.f32.xlu1 %v1097_v2  ;;  %v1099_v6 = vmul.f32 %v2116_v3, %v2515_v24  ;;  %v2607_v33 = vpop.permute.xlu0 %1264  ;;  %vm1310_vm3 = vcmp.eq.s32.totalorder %v2559_v50, %v2639_v54  ;;  %vm1312_vm5 = vcmp.eq.s32.totalorder %v2566_v61, %v2639_v54 }
 0x238   : > { %1154 = vadd.xlane.f32.xlu0 %v1098_v4  ;;  %vm1309_vm2 = vcmp.eq.s32.totalorder %v1214_v21, %v2641_v55  ;;  %vm1311_vm4 = vcmp.eq.s32.totalorder %v2559_v50, %v2641_v55  ;;  %vm1313_vm6 = vcmp.eq.s32.totalorder %v2566_v61, %v2641_v55  ;;  %vm1314_vm7 = vcmp.eq.s32.totalorder %v2573_v8, %v2639_v54 }
 0x239   : > { %v2118_v5 = vpop.eup %2117  ;;  %vm1315_vm8 = vcmp.eq.s32.totalorder %v2573_v8, %v2641_v55  ;;  %vm1316_vm9 = vcmp.eq.s32.totalorder %v2578_v14, %v2639_v54  ;;  %vm1317_vm10 = vcmp.eq.s32.totalorder %v2578_v14, %v2641_v55  ;;  %vm1318_vm11 = vcmp.eq.s32.totalorder %v2583_v19, %v2639_v54 }
 0x23a   : > { %v2120_v7 = vpop.eup %2119  ;;  %v1100_v9 = vmul.f32 %v2118_v5, %v2515_v24  ;;  %vm1319_vm12 = vcmp.eq.s32.totalorder %v2583_v19, %v2641_v55  ;;  %vm1320_vm13 = vcmp.eq.s32.totalorder %v2585_v20, %v2639_v54  ;;  %vm1321_vm14 = vcmp.eq.s32.totalorder %v2585_v20, %v2641_v55 }
 0x23b   : > { %1156 = vadd.xlane.f32.xlu1 %v1099_v6  ;;  %v1101_v10 = vmul.f32 %v2120_v7, %v2515_v24  ;;  %v2611_v35 = vpop.permute.xlu0 %1270  ;;  %vm1322_vm15 = vcmp.eq.s32.totalorder %v2587_v22, %v2639_v54  ;;  %vm1323_vm0 = vcmp.eq.s32.totalorder %v2587_v22, %v2641_v55 }
 0x23c   : > { %1158 = vadd.xlane.f32.xlu0 %v1100_v9 }
 0x23d   : > { %v2122_v38 = vpop.eup %2121 }
 0x23e   : > { %v2124_v11 = vpop.eup %2123  ;;  %v1102_v12 = vmul.f32 %v2122_v38, %v2515_v24 }
 0x23f   : > { %1160 = vadd.xlane.f32.xlu1 %v1101_v10  ;;  %v1103_v16 = vmul.f32 %v2124_v11, %v2515_v24  ;;  %v2615_v37 = vpop.permute.xlu0 %1276 }
 0x240   : > { %v2126_v13 = vpop.eup %2125  ;;  %1162 = vadd.xlane.f32.xlu0 %v1102_v12 }
 0x241   : > { %v2128_v15 = vpop.eup %2127  ;;  %v1105_v17 = vmul.f32 %v2126_v13, %v2515_v24 }
 0x242   : > { %v1104_v18 = vmul.f32 %v2128_v15, %v2515_v24  ;;  %v2597_v24 = vpop.permute.xlu1 %1243 }
 0x243   : > { %1164 = vadd.xlane.f32.xlu1 %v1103_v16  ;;  %v2619_v40 = vpop.permute.xlu0 %1282 }
 0x244   : > { %1166 = vadd.xlane.f32.xlu0 %v1104_v18 }
 0x246   : > { %v2601_v30 = vpop.permute.xlu1 %1249 }
 0x247   : > { %1168 = vadd.xlane.f32.xlu1 %v1105_v17  ;;  %v2623_v42 = vpop.permute.xlu0 %1288 }
 0x24a   : > { %v2605_v32 = vpop.permute.xlu1 %1255 }
 0x24b   : > { %v2630_v45 = vpop.permute.xlu0 %1294 }
 0x24e   : > { %v2609_v34 = vpop.permute.xlu1 %1261 }
 0x24f   : > { %v2635_v48 = vpop.permute.xlu0 %1300 }
 0x252   : > { %v2613_v36 = vpop.permute.xlu1 %1267 }
 0x256   : > { %v2617_v39 = vpop.permute.xlu1 %1273 }
 0x258   : > { %1303 = vperm.xlu1 %2000, %v1203_v25  }
 0x25a   : > { %1306 = vperm.xlu0 %1999, %v1204_v26   ;;  %v2621_v41 = vpop.permute.xlu1 %1279 }
 0x25e   : > { %v2628_v43 = vpop.permute.xlu1 %1285 }
 0x262   : > { %v2632_v47 = vpop.permute.xlu1 %1291 }
 0x266   : > { %v2637_v52 = vpop.permute.xlu1 %1297 }
 0x294   : > { %v1109_v53 = vpop.xlane.xlu0 %1108 }
 0x295   : > { %v1374_v60 = vsel %vm1310_vm3, %v1109_v53, 0.0  ;;  %v1375_v62 = vsel %vm1311_vm4, %v1109_v53, 0.0  ;;  %vm1326_vm3 = vcmp.eq.s32.totalorder %v2589_v23, %v2639_v54  ;;  %vm1327_vm4 = vcmp.eq.s32.totalorder %v2589_v23, %v2641_v55 }
 0x298   : > { %v1113_v56 = vpop.xlane.xlu1 %1112  ;;  %v1107_v57 = vpop.xlane.xlu0 %1106 }
 0x299   : > { %v1372_v58 = vsel %vm1308_vm1, %v1107_v57, 0.0  ;;  %v1373_v59 = vsel %vm1309_vm2, %v1107_v57, 0.0  ;;  %v1378_v6 = vsel %vm1314_vm7, %v1113_v56, 0.0  ;;  %v1379_v7 = vsel %vm1315_vm8, %v1113_v56, 0.0 }
 0x29a   : > { %v1436_v63 = vadd.f32 %v1374_v60, %v1372_v58  ;;  %v1473_v0 = vadd.f32 %v1375_v62, %v1373_v59  ;;  %vm1324_vm1 = vcmp.eq.s32.totalorder %v2593_v27, %v2639_v54  ;;  %vm1325_vm2 = vcmp.eq.s32.totalorder %v2593_v27, %v2641_v55 }
 0x29b   : > { %vm1330_vm7 = vcmp.eq.s32.totalorder %v2595_v28, %v2639_v54  ;;  %vm1331_vm8 = vcmp.eq.s32.totalorder %v2595_v28, %v2641_v55 }
 0x29c   : > { %v1111_v1 = vpop.xlane.xlu1 %1110 }
 0x29d   : > { %v1376_v2 = vsel %vm1312_vm5, %v1111_v1, 0.0  ;;  %v1377_v3 = vsel %vm1313_vm6, %v1111_v1, 0.0  ;;  %v1115_v4 = vpop.xlane.xlu0 %1114  ;;  %vm1328_vm5 = vcmp.eq.s32.totalorder %v2597_v24, %v2639_v54  ;;  %vm1329_vm6 = vcmp.eq.s32.totalorder %v2597_v24, %v2641_v55 }
 0x29e   : > { %v1437_v50 = vadd.f32 %v1436_v63, %v1376_v2  ;;  %v1474_v5 = vadd.f32 %v1473_v0, %v1377_v3  ;;  %v1380_v10 = vsel %vm1316_vm9, %v1115_v4, 0.0  ;;  %v1381_v11 = vsel %vm1317_vm10, %v1115_v4, 0.0 }
 0x29f   : > { %vm1332_vm9 = vcmp.eq.s32.totalorder %v2601_v30, %v2639_v54  ;;  %vm1333_vm10 = vcmp.eq.s32.totalorder %v2601_v30, %v2641_v55 }
 0x2a0   : > { %v1438_v61 = vadd.f32 %v1437_v50, %v1378_v6  ;;  %v1475_v9 = vadd.f32 %v1474_v5, %v1379_v7  ;;  %v1117_v38 = vpop.xlane.xlu1 %1116 }
 0x2a1   : > { %v1119_v12 = vpop.xlane.xlu0 %1118  ;;  %v1382_v15 = vsel %vm1318_vm11, %v1117_v38, 0.0  ;;  %v1383_v16 = vsel %vm1319_vm12, %v1117_v38, 0.0  ;;  %vm1334_vm11 = vcmp.eq.s32.totalorder %v2599_v29, %v2639_v54  ;;  %vm1335_vm12 = vcmp.eq.s32.totalorder %v2599_v29, %v2641_v55 }
 0x2a2   : > { %v1439_v8 = vadd.f32 %v1438_v61, %v1380_v10  ;;  %v1476_v13 = vadd.f32 %v1475_v9, %v1381_v11  ;;  %v1384_v21 = vsel %vm1320_vm13, %v1119_v12, 0.0  ;;  %v1385_v25 = vsel %vm1321_vm14, %v1119_v12, 0.0 }
 0x2a3   : > { %vm1336_vm13 = vcmp.eq.s32.totalorder %v2605_v32, %v2639_v54  ;;  %vm1337_vm14 = vcmp.eq.s32.totalorder %v2605_v32, %v2641_v55 }
 0x2a4   : > { %v1440_v14 = vadd.f32 %v1439_v8, %v1382_v15  ;;  %v1477_v17 = vadd.f32 %v1476_v13, %v1383_v16  ;;  %v1121_v18 = vpop.xlane.xlu1 %1120 }
 0x2a5   : > { %v1123_v26 = vpop.xlane.xlu0 %1122  ;;  %v1386_v46 = vsel %vm1322_vm15, %v1121_v18, 0.0  ;;  %v1387_v49 = vsel %vm1323_vm0, %v1121_v18, 0.0  ;;  %vm1338_vm15 = vcmp.eq.s32.totalorder %v2603_v31, %v2639_v54  ;;  %vm1339_vm0 = vcmp.eq.s32.totalorder %v2603_v31, %v2641_v55 }
 0x2a6   : > { %v1441_v19 = vadd.f32 %v1440_v14, %v1384_v21  ;;  %v1478_v44 = vadd.f32 %v1477_v17, %v1385_v25  ;;  %v1388_v56 = vsel %vm1324_vm1, %v1123_v26, 0.0  ;;  %v1389_v57 = vsel %vm1325_vm2, %v1123_v26, 0.0 }
 0x2a7   : > { %vm1340_vm1 = vcmp.eq.s32.totalorder %v2609_v34, %v2639_v54  ;;  %vm1341_vm2 = vcmp.eq.s32.totalorder %v2609_v34, %v2641_v55 }
 0x2a8   : > { %v1442_v20 = vadd.f32 %v1441_v19, %v1386_v46  ;;  %v1479_v51 = vadd.f32 %v1478_v44, %v1387_v49  ;;  %v1125_v53 = vpop.xlane.xlu1 %1124 }
 0x2a9   : > { %v1127_v58 = vpop.xlane.xlu0 %1126  ;;  %v1390_v60 = vsel %vm1326_vm3, %v1125_v53, 0.0  ;;  %v1391_v62 = vsel %vm1327_vm4, %v1125_v53, 0.0  ;;  %vm1342_vm3 = vcmp.eq.s32.totalorder %v2607_v33, %v2639_v54  ;;  %vm1343_vm4 = vcmp.eq.s32.totalorder %v2607_v33, %v2641_v55 }
 0x2aa   : > { %v1443_v22 = vadd.f32 %v1442_v20, %v1388_v56  ;;  %v1480_v59 = vadd.f32 %v1479_v51, %v1389_v57  ;;  %v1392_v1 = vsel %vm1328_vm5, %v1127_v58, 0.0  ;;  %v1393_v2 = vsel %vm1329_vm6, %v1127_v58, 0.0 }
 0x2ab   : > { %vm1344_vm5 = vcmp.eq.s32.totalorder %v2613_v36, %v2639_v54  ;;  %vm1345_vm6 = vcmp.eq.s32.totalorder %v2613_v36, %v2641_v55 }
 0x2ac   : > { %v1444_v27 = vadd.f32 %v1443_v22, %v1390_v60  ;;  %v1481_v63 = vadd.f32 %v1480_v59, %v1391_v62  ;;  %v1129_v0 = vpop.xlane.xlu1 %1128 }
 0x2ad   : > { %v1131_v3 = vpop.xlane.xlu0 %1130  ;;  %v1394_v50 = vsel %vm1330_vm7, %v1129_v0, 0.0  ;;  %v1395_v5 = vsel %vm1331_vm8, %v1129_v0, 0.0  ;;  %vm1346_vm7 = vcmp.eq.s32.totalorder %v2611_v35, %v2639_v54  ;;  %vm1347_vm8 = vcmp.eq.s32.totalorder %v2611_v35, %v2641_v55 }
 0x2ae   : > { %v1445_v23 = vadd.f32 %v1444_v27, %v1392_v1  ;;  %v1482_v4 = vadd.f32 %v1481_v63, %v1393_v2  ;;  %v1396_v61 = vsel %vm1332_vm9, %v1131_v3, 0.0  ;;  %v1397_v9 = vsel %vm1333_vm10, %v1131_v3, 0.0 }
 0x2af   : > { %vm1348_vm9 = vcmp.eq.s32.totalorder %v2617_v39, %v2639_v54  ;;  %vm1349_vm10 = vcmp.eq.s32.totalorder %v2617_v39, %v2641_v55 }
 0x2b0   : > { %v1446_v24 = vadd.f32 %v1445_v23, %v1394_v50  ;;  %v1483_v6 = vadd.f32 %v1482_v4, %v1395_v5  ;;  %v1133_v7 = vpop.xlane.xlu1 %1132 }
 0x2b1   : > { %v1135_v38 = vpop.xlane.xlu0 %1134  ;;  %v1398_v11 = vsel %vm1334_vm11, %v1133_v7, 0.0  ;;  %v1399_v12 = vsel %vm1335_vm12, %v1133_v7, 0.0  ;;  %vm1350_vm11 = vcmp.eq.s32.totalorder %v2615_v37, %v2639_v54  ;;  %vm1351_vm12 = vcmp.eq.s32.totalorder %v2615_v37, %v2641_v55 }
 0x2b2   : > { %v1447_v28 = vadd.f32 %v1446_v24, %v1396_v61  ;;  %v1484_v10 = vadd.f32 %v1483_v6, %v1397_v9  ;;  %v1400_v15 = vsel %vm1336_vm13, %v1135_v38, 0.0  ;;  %v1401_v16 = vsel %vm1337_vm14, %v1135_v38, 0.0 }
 0x2b3   : > { %vm1352_vm13 = vcmp.eq.s32.totalorder %v2621_v41, %v2639_v54  ;;  %vm1353_vm14 = vcmp.eq.s32.totalorder %v2621_v41, %v2641_v55 }
 0x2b4   : > { %v1448_v30 = vadd.f32 %v1447_v28, %v1398_v11  ;;  %v1485_v8 = vadd.f32 %v1484_v10, %v1399_v12  ;;  %v1137_v13 = vpop.xlane.xlu1 %1136 }
 0x2b5   : > { %v1139_v14 = vpop.xlane.xlu0 %1138  ;;  %v1402_v18 = vsel %vm1338_vm15, %v1137_v13, 0.0  ;;  %v1403_v21 = vsel %vm1339_vm0, %v1137_v13, 0.0  ;;  %vm1354_vm15 = vcmp.eq.s32.totalorder %v2619_v40, %v2639_v54  ;;  %vm1355_vm0 = vcmp.eq.s32.totalorder %v2619_v40, %v2641_v55 }
 0x2b6   : > { %v1449_v29 = vadd.f32 %v1448_v30, %v1400_v15  ;;  %v1486_v17 = vadd.f32 %v1485_v8, %v1401_v16  ;;  %v1404_v19 = vsel %vm1340_vm1, %v1139_v14, 0.0  ;;  %v1405_v44 = vsel %vm1341_vm2, %v1139_v14, 0.0 }
 0x2b7   : > { %vm1356_vm1 = vcmp.eq.s32.totalorder %v2628_v43, %v2639_v54  ;;  %vm1357_vm2 = vcmp.eq.s32.totalorder %v2628_v43, %v2641_v55 }
 0x2b8   : > { %v1450_v32 = vadd.f32 %v1449_v29, %v1402_v18  ;;  %v1487_v25 = vadd.f32 %v1486_v17, %v1403_v21  ;;  %v1141_v26 = vpop.xlane.xlu1 %1140 }
 0x2b9   : > { %v1143_v46 = vpop.xlane.xlu0 %1142  ;;  %v1406_v20 = vsel %vm1342_vm3, %v1141_v26, 0.0  ;;  %v1407_v51 = vsel %vm1343_vm4, %v1141_v26, 0.0  ;;  %vm1358_vm3 = vcmp.eq.s32.totalorder %v2623_v42, %v2639_v54  ;;  %vm1359_vm4 = vcmp.eq.s32.totalorder %v2623_v42, %v2641_v55 }
 0x2ba   : > { %v1451_v31 = vadd.f32 %v1450_v32, %v1404_v19  ;;  %v1488_v49 = vadd.f32 %v1487_v25, %v1405_v44  ;;  %v1408_v57 = vsel %vm1344_vm5, %v1143_v46, 0.0  ;;  %v1409_v58 = vsel %vm1345_vm6, %v1143_v46, 0.0 }
 0x2bb   : > { %vm1360_vm5 = vcmp.eq.s32.totalorder %v2632_v47, %v2639_v54  ;;  %vm1361_vm6 = vcmp.eq.s32.totalorder %v2632_v47, %v2641_v55 }
 0x2bc   : > { %v1452_v34 = vadd.f32 %v1451_v31, %v1406_v20  ;;  %v1489_v53 = vadd.f32 %v1488_v49, %v1407_v51  ;;  %v1145_v56 = vpop.xlane.xlu1 %1144 }
 0x2bd   : > { %v1147_v22 = vpop.xlane.xlu0 %1146  ;;  %v1410_v60 = vsel %vm1346_vm7, %v1145_v56, 0.0  ;;  %v1411_v62 = vsel %vm1347_vm8, %v1145_v56, 0.0  ;;  %vm1362_vm7 = vcmp.eq.s32.totalorder %v2630_v45, %v2639_v54  ;;  %vm1363_vm8 = vcmp.eq.s32.totalorder %v2630_v45, %v2641_v55 }
 0x2be   : > { %v1453_v33 = vadd.f32 %v1452_v34, %v1408_v57  ;;  %v1490_v59 = vadd.f32 %v1489_v53, %v1409_v58  ;;  %v1412_v0 = vsel %vm1348_vm9, %v1147_v22, 0.0  ;;  %v1413_v1 = vsel %vm1349_vm10, %v1147_v22, 0.0 }
 0x2bf   : > { %vm1364_vm9 = vcmp.eq.s32.totalorder %v2637_v52, %v2639_v54  ;;  %vm1365_vm10 = vcmp.eq.s32.totalorder %v2637_v52, %v2641_v55 }
 0x2c0   : > { %v1454_v36 = vadd.f32 %v1453_v33, %v1410_v60  ;;  %v1491_v27 = vadd.f32 %v1490_v59, %v1411_v62  ;;  %v1149_v63 = vpop.xlane.xlu1 %1148 }
 0x2c1   : > { %v1151_v2 = vpop.xlane.xlu0 %1150  ;;  %v1414_v23 = vsel %vm1350_vm11, %v1149_v63, 0.0  ;;  %v1415_v4 = vsel %vm1351_vm12, %v1149_v63, 0.0  ;;  %vm1366_vm11 = vcmp.eq.s32.totalorder %v2635_v48, %v2639_v54  ;;  %vm1367_vm12 = vcmp.eq.s32.totalorder %v2635_v48, %v2641_v55 }
 0x2c2   : > { %v1455_v35 = vadd.f32 %v1454_v36, %v1412_v0  ;;  %v1492_v3 = vadd.f32 %v1491_v27, %v1413_v1  ;;  %v1416_v24 = vsel %vm1352_vm13, %v1151_v2, 0.0  ;;  %v1417_v6 = vsel %vm1353_vm14, %v1151_v2, 0.0 }
 0x2c4   : > { %v1456_v39 = vadd.f32 %v1455_v35, %v1414_v23  ;;  %v1493_v50 = vadd.f32 %v1492_v3, %v1415_v4  ;;  %v1153_v5 = vpop.xlane.xlu1 %1152 }
 0x2c5   : > { %v1155_v7 = vpop.xlane.xlu0 %1154  ;;  %v1418_v9 = vsel %vm1354_vm15, %v1153_v5, 0.0  ;;  %v1419_v38 = vsel %vm1355_vm0, %v1153_v5, 0.0 }
 0x2c6   : > { %v1457_v37 = vadd.f32 %v1456_v39, %v1416_v24  ;;  %v1494_v61 = vadd.f32 %v1493_v50, %v1417_v6  ;;  %v1420_v11 = vsel %vm1356_vm1, %v1155_v7, 0.0  ;;  %v1421_v12 = vsel %vm1357_vm2, %v1155_v7, 0.0  ;;  %v1641_v39 = vld [vmem:[%s1510_s23 + $0x1] sm:$0x1] }
 0x2c8   : > { %v1458_v41 = vadd.f32 %v1457_v37, %v1418_v9  ;;  %v1495_v28 = vadd.f32 %v1494_v61, %v1419_v38  ;;  %v1157_v10 = vpop.xlane.xlu1 %1156 }
 0x2c9   : > { %v1159_v30 = vpop.xlane.xlu0 %1158  ;;  %v1422_v13 = vsel %vm1358_vm3, %v1157_v10, 0.0  ;;  %v1423_v15 = vsel %vm1359_vm4, %v1157_v10, 0.0 }
 0x2ca   : > { %v1459_v40 = vadd.f32 %v1458_v41, %v1420_v11  ;;  %v1496_v8 = vadd.f32 %v1495_v28, %v1421_v12  ;;  %v1424_v29 = vsel %vm1360_vm5, %v1159_v30, 0.0  ;;  %v1425_v17 = vsel %vm1361_vm6, %v1159_v30, 0.0 }
 0x2cc   : > { %v1460_v43 = vadd.f32 %v1459_v40, %v1422_v13  ;;  %v1497_v16 = vadd.f32 %v1496_v8, %v1423_v15  ;;  %v1161_v14 = vpop.xlane.xlu1 %1160 }
 0x2cd   : > { %v1163_v21 = vpop.xlane.xlu0 %1162  ;;  %v1426_v32 = vsel %vm1362_vm7, %v1161_v14, 0.0  ;;  %v1427_v25 = vsel %vm1363_vm8, %v1161_v14, 0.0 }
 0x2ce   : > { %v1461_v42 = vadd.f32 %v1460_v43, %v1424_v29  ;;  %v1498_v18 = vadd.f32 %v1497_v16, %v1425_v17  ;;  %v1428_v44 = vsel %vm1364_vm9, %v1163_v21, 0.0  ;;  %v1429_v46 = vsel %vm1365_vm10, %v1163_v21, 0.0 }
 0x2d0   : > { %v1462_v47 = vadd.f32 %v1461_v42, %v1426_v32  ;;  %v1499_v26 = vadd.f32 %v1498_v18, %v1427_v25  ;;  %v1165_v19 = vpop.xlane.xlu1 %1164 }
 0x2d1   : > { %v1430_v49 = vsel %vm1366_vm11, %v1165_v19, 0.0  ;;  %v1431_v20 = vsel %vm1367_vm12, %v1165_v19, 0.0  ;;  %v1167_v56 = vpop.xlane.xlu0 %1166 }
 0x2d2   : > { %v1463_v45 = vadd.f32 %v1462_v47, %v1428_v44  ;;  %v1500_v31 = vadd.f32 %v1499_v26, %v1429_v46 }
 0x2d4   : > { %v1464_v51 = vadd.f32 %v1463_v45, %v1430_v49  ;;  %v1501_v34 = vadd.f32 %v1500_v31, %v1431_v20  ;;  %v1169_v53 = vpop.xlane.xlu1 %1168 }
 0x2d8   : > { %v1304_v52 = vpop.permute.xlu1 %1303 }
 0x2d9   : > { %vm1368_vm13 = vcmp.eq.s32.totalorder %v1304_v52, %v2639_v54  ;;  %vm1369_vm14 = vcmp.eq.s32.totalorder %v1304_v52, %v2641_v55  ;;  %v1307_v57 = vpop.permute.xlu0 %1306 }
 0x2da   : > { %v1432_v58 = vsel %vm1368_vm13, %v1167_v56, 0.0  ;;  %v1433_v22 = vsel %vm1369_vm14, %v1167_v56, 0.0  ;;  %vm1370_vm15 = vcmp.eq.s32.totalorder %v1307_v57, %v2639_v54  ;;  %vm1371_vm0 = vcmp.eq.s32.totalorder %v1307_v57, %v2641_v55  ;;  %v1511_v55 = vld [vmem:[%s1510_s23] sm:$0x1] }
 0x2db   : > { %v1465_v48 = vadd.f32 %v1464_v51, %v1432_v58  ;;  %v1502_v33 = vadd.f32 %v1501_v34, %v1433_v22  ;;  %v1434_v59 = vsel %vm1370_vm15, %v1169_v53, 0.0  ;;  %v1435_v60 = vsel %vm1371_vm0, %v1169_v53, 0.0 }
 0x2dd   : > { %v1466_v62 = vadd.f32 %v1465_v48, %v1434_v59  ;;  %v1503_v36 = vadd.f32 %v1502_v33, %v1435_v60 }
 0x2df   : > { %v1467_v27 = vrot.slane %v1466_v62, 4  ;;  %v1504_v63 = vrot.slane %v1503_v36, 4 }
 0x2e1   : > { %v1468_v0 = vadd.f32 %v1467_v27, %v1466_v62  ;;  %v1505_v1 = vadd.f32 %v1504_v63, %v1503_v36 }
 0x2e3   : > { %v1469_v2 = vrot.slane %v1468_v0, 2  ;;  %v1506_v35 = vrot.slane %v1505_v1, 2 }
 0x2e5   : > { %v1470_v3 = vadd.f32 %v1469_v2, %v1468_v0  ;;  %v1507_v23 = vadd.f32 %v1506_v35, %v1505_v1 }
 0x2e7   : > { %v1471_v4 = vrot.slane %v1470_v3, 1  ;;  %v1508_v54 = vrot.slane %v1507_v23, 1 }
 0x2e9   : > { %v1472_v50 = vadd.f32 %v1471_v4, %v1470_v3  ;;  %v1509_v5 = vadd.f32 %v1508_v54, %v1507_v23 }
 0x2eb   : > { %v1512_v24 = vadd.f32 %v1511_v55, %v1472_v50  ;;  %v1517_v6 = vadd.f32 %v1641_v39, %v1509_v5 }
 0x2ed   : > { %1513 = vst [vmem:[%s1510_s23] sm:$0x1] %v1512_v24  ;;  %1642 = vst [vmem:[%s1510_s23 + $0x1] sm:$0x1] %v1517_v6 }
 0x2ee   : > { %2154 = shalt.err (!%p2151_p6)
}
 0x2ef   : > { %s2155_s29 = scalar_lea.hbm %s2811_s8, 48 }
 0x2f0   : > { %p2156_p7 = scmp.ne.s32.totalorder %s2811_s8, %s2155_s29  ;;  %p2161_p10 = scmp.lt.u32.totalorder %s2155_s29, %s2811_s8 }
 0x2f2   : > { %p2157_p8 = pnand %p2156_p7, %p2768_p13 }
 0x2f4   : > { %p2158_p9 = pneg %p2157_p8 }
 0x2f6   : > { %p2163_p11 = pnand %p2161_p10, %p2158_p9 }
 0x2f8   : > { %2166 = shalt.err (!%p2163_p11)
}
 0x2f9   : > { %s2201_s15 = smov 16   ;;  %s2202_s16 = smov 1  }
 0x2fa   : > { %1964 = dma.vmem_to_hbm [thread:$0]  (%p2768_p13), %s1529_s22, 48, %s2811_s8, [#allocation5], %s2201_s15, %s2201_s15, %s2202_s16  }
 0x2fb   : > { %2182 = dma.done.wait (%p2768_p13), [#allocation5], 48  }
 0x2fc   : > { %2184 = vsyncadd (%p2768_p13), [#allocation5], 4294967248 }
 0x2fd PF: > { %s25_s12 = sadd.s32 1, %s2195_s12   ;;  %s2813_s10 = smov %s2191_s11 }
 0x2fe   : > { %p22_p12 = scmp.ge.s32.totalorder %s25_s12, 6   ;;  %s2814_s11 = smov %s2816_s13 }
 0x300   :  { %24 = sbr.rel (!%p22_p12) target bundleno = 17 (0x11), region = 85 }
 0x307   :  { %1544 = vsyncpa [#allocation5], 1 }
 0x308   :  { %1546 = vsyncpa [#allocation5 + $0x1], 1 }

</bundles_post_ra>
